<compile_context>
chip_gen: v7x
topology: tpu7x:2x2x1
jax: 0.10.0
libtpu: 0.0.40
codegen_flags: <defaults>
</compile_context>

<pallas_src>
import functools

import jax
import jax.numpy as jnp
from jax import lax
from jax.experimental import pallas as pl
from jax.experimental.pallas import tpu as pltpu


def _sepconv_kernel(x_ref, top_ref, bot_ref, wdw_ref, wpw_ref, bias_ref, o_ref,
                    *, Nb, SH, W, Cin, Cp):
    """One (batch-block, H-strip) tile.

    x_ref   : (Nb, SH, W, Cin)  strip of the unpadded NHWC input
    top_ref : (Nb, 1, W, Cin)   row just above the strip (clamped at the image top)
    bot_ref : (Nb, 1, W, Cin)   row just below the strip (clamped at the image bottom)
    wdw_ref : (3, 3, Cin)       depthwise weights
    wpw_ref : (Cin, Cp) bf16    pointwise weights with both BNs folded in (Cout padded to Cp)
    bias_ref: (1, Cp)   f32     folded bias
    o_ref   : (Nb, SH, W, Cp)
    """
    f32 = jnp.float32
    s = pl.program_id(1)
    last = pl.num_programs(1) - 1

    # Hoisted edge-column masks for the horizontal taps (lane-broadcast (1,1,W,1)).
    col = lax.broadcasted_iota(jnp.int32, (1, 1, W, 1), 2)
    lmask = (col > 0).astype(f32)        # zero where the left  neighbour falls off the image
    rmask = (col < W - 1).astype(f32)    # zero where the right neighbour falls off the image

    wdw = wdw_ref[...].astype(f32)       # (3, 3, Cin), read once

    def hconv(v, dh):
        # 3 horizontal taps of depthwise-weight row `dh` with zero padding in W.
        # pltpu.roll follows jnp.roll semantics: roll(v, 1)[w] == v[w-1].
        vl = pltpu.roll(v, shift=1, axis=2) * lmask      # x[.., w-1, :]
        vr = pltpu.roll(v, shift=W - 1, axis=2) * rmask  # x[.., w+1, :]
        return vl * wdw[dh, 0, :] + v * wdw[dh, 1, :] + vr * wdw[dh, 2, :]

    x = x_ref[...].astype(f32)                           # (Nb, SH, W, Cin)
    # Halo rows; a scalar 0/1 factor implements the zero padding at the image
    # top/bottom (the index_map clamps to a duplicate in-image row there).
    top = top_ref[...].astype(f32) * (s != 0).astype(f32)
    bot = bot_ref[...].astype(f32) * (s != last).astype(f32)

    h0 = hconv(x, 0)       # vertical tap dh = -1, evaluated at every strip row
    h1 = hconv(x, 1)       # dh =  0
    h2 = hconv(x, 2)       # dh = +1
    t0 = hconv(top, 0)     # dh = -1 contribution from the row above the strip
    b2 = hconv(bot, 2)     # dh = +1 contribution from the row below the strip

    # out[h] = h0[h-1] + h1[h] + h2[h+1]; rows -1 / SH are the halo rows.
    # All slices/concats are along the leading H dim -> whole (W, Cin) tiles, aligned.
    if SH > 1:
        above = jnp.concatenate([t0, h0[:, :SH - 1]], axis=1)
        below = jnp.concatenate([h2[:, 1:], b2], axis=1)
    else:
        above, below = t0, b2
    acc = h1 + above + below                              # raw depthwise output, f32

    # Pointwise 1x1 conv + both folded BNs: one bf16 MXU matmul with f32 accumulation.
    # The reshapes only merge leading dims (free relayout) when W % 8 == 0; they are
    # always correct regardless.
    y = jnp.dot(acc.astype(jnp.bfloat16).reshape(Nb * SH * W, Cin), wpw_ref[...],
                preferred_element_type=jnp.float32)
    y = y + bias_ref[...]
    o_ref[...] = y.reshape(Nb, SH, W, Cp).astype(o_ref.dtype)


def _round_up(a, b):
    return -(-a // b) * b


def sep_conv_nhwc(x, w_dw, w_pw, s1, b1, s2, b2, *,
                  strip_rows=None, batch_block=None, cout_pad_to=None):
    """x: (N, H, W, Cin) NHWC activations (keep NHWC end-to-end -> no transposes).
    w_dw: (3, 3, Cin)  depthwise weights (PyTorch (Cin,1,3,3)[c,0,i,j] -> w_dw[i,j,c]).
    w_pw: (Cin, Cout)  pointwise weights (PyTorch (Cout,Cin,1,1)[o,c,0,0] -> w_pw[c,o]).
    (s1, b1) / (s2, b2): eval-mode BatchNorm scale/shift for the in/out channels.
    Returns (N, H, W, Cout) in x.dtype (pass bf16 activations to halve HBM traffic)."""
    N, H, W, Cin = x.shape
    Cout = w_pw.shape[1]

    # ---- fold both BatchNorms into the pointwise conv ----
    #   ((dw * s1 + b1) @ w_pw) * s2 + b2
    #     = dw @ (s1[:,None] * w_pw * s2[None,:]) + ((b1 @ w_pw) * s2 + b2)
    w_pw32 = w_pw.astype(jnp.float32)
    w_fold = (s1[:, None] * w_pw32) * s2[None, :]
    b_fold = (b1 @ w_pw32) * s2 + b2

    # ---- lane-dense output channels ----
    # Pad Cout to a multiple of 128 when it is large but misaligned (e.g. Xception's
    # 728 -> 768): unmasked full-lane output stores + filled MXU N tiles.
    # (On v6e, 256 alignment is preferable: pass cout_pad_to explicitly.)
    if cout_pad_to is None:
        cout_pad_to = _round_up(Cout, 128) if Cout >= 128 else Cout
    Cp = int(cout_pad_to)
    assert Cp >= Cout
    if Cp > Cout:
        w_fold = jnp.pad(w_fold, ((0, 0), (0, Cp - Cout)))
        b_fold = jnp.pad(b_fold, ((0, Cp - Cout),))
    w_pw_f = w_fold.astype(jnp.bfloat16)                 # bf16 MXU operand
    bias = b_fold.astype(jnp.float32).reshape(1, Cp)

    # ---- per-generation VMEM budget & blocking ----
    try:
        vmem_cap = int(pltpu.get_tpu_info().vmem_capacity_bytes)   # 128 MiB v5e/v6e, 64 MiB/TC v7x
    except Exception:
        vmem_cap = 64 << 20
    vmem_limit = min(vmem_cap * 3 // 4, 48 << 20)        # 48 MiB scoped: safe on all generations
    budget = vmem_limit * 3 // 5                         # headroom for compiler temporaries

    xbytes = jnp.dtype(x.dtype).itemsize
    wbytes = 2 * (9 * Cin * 4 + Cin * Cp * 2 + Cp * 4)   # (double-buffered) constant blocks

    def footprint(nb, sh):
        strip_in = nb * sh * W * Cin * xbytes            # input strip
        halos = 2 * nb * W * Cin * xbytes                # top + bottom halo rows
        strip_out = nb * sh * W * Cp * xbytes            # output strip
        # live in-body values: ~6 f32 Cin-wide slabs + bf16 MXU operand + f32 result
        live = nb * sh * W * (6 * Cin * 4 + Cin * 2 + Cp * 4)
        return 2 * (strip_in + halos + strip_out) + wbytes + live

    if strip_rows is None:
        cands = [d for d in range(1, H + 1) if H % d == 0 and footprint(1, d) <= budget]
        strip_rows = max(cands) if cands else 1
    SH = int(strip_rows)
    assert H % SH == 0, "strip_rows must divide H"
    n_strips = H // SH

    if batch_block is None:
        # Keep >= min(8, max possible) parallel grid steps (v7x megacore sharding)
        # while growing the tile as large as the VMEM budget allows.
        min_steps = min(8, N * n_strips)
        cands = [d for d in range(1, N + 1)
                 if N % d == 0 and footprint(d, SH) <= budget
                 and (N // d) * n_strips >= min_steps]
        batch_block = max(cands) if cands else 1
    Nb = int(batch_block)
    assert N % Nb == 0, "batch_block must divide N"

    kernel = functools.partial(_sepconv_kernel, Nb=Nb, SH=SH, W=W, Cin=Cin, Cp=Cp)

    out = pl.pallas_call(
        kernel,
        out_shape=jax.ShapeDtypeStruct((N, H, W, Cp), x.dtype),
        grid_spec=pltpu.PrefetchScalarGridSpec(
            num_scalar_prefetch=0,
            grid=(N // Nb, n_strips),
            in_specs=[
                # strip of the (unpadded) NHWC input
                pl.BlockSpec((Nb, SH, W, Cin), lambda nb, s: (nb, s, 0, 0)),
                # halo row just above / below the strip (same unpadded array;
                # clamped at the image borders, zeroed inside the kernel)
                pl.BlockSpec((Nb, 1, W, Cin),
                             lambda nb, s: (nb, jnp.maximum(s * SH - 1, 0), 0, 0)),
                pl.BlockSpec((Nb, 1, W, Cin),
                             lambda nb, s: (nb, jnp.minimum((s + 1) * SH, H - 1), 0, 0)),
                pl.BlockSpec((3, 3, Cin), lambda nb, s: (0, 0, 0)),
                pl.BlockSpec((Cin, Cp), lambda nb, s: (0, 0)),
                pl.BlockSpec((1, Cp), lambda nb, s: (0, 0)),
            ],
            out_specs=pl.BlockSpec((Nb, SH, W, Cp), lambda nb, s: (nb, s, 0, 0)),
        ),
        compiler_params=pltpu.CompilerParams(
            dimension_semantics=("parallel", "parallel"),
            vmem_limit_bytes=int(vmem_limit)),
    )(x, x, x, w_dw, w_pw_f, bias)

    return out if Cp == Cout else out[..., :Cout]


def sep_conv(x_nchw, w_dw, w_pw, s1, b1, s2, b2, **kw):
    """NCHW compatibility shim matching the PyTorch module interface.  In a real
    network keep activations NHWC end-to-end and call sep_conv_nhwc directly — these
    two transposes are exactly the extra HBM passes the NHWC path removes."""
    x = jnp.transpose(x_nchw, (0, 2, 3, 1))
    y = sep_conv_nhwc(x, w_dw, w_pw, s1, b1, s2, b2, **kw)
    return jnp.transpose(y, (0, 3, 1, 2))


def sep_conv_ref_nhwc(x_nhwc, w_dw, w_pw, s1, b1, s2, b2):
    """Plain-JAX NHWC reference (matches eval-mode PyTorch SepConv semantics),
    with the BatchNorms applied separately (validates the folding)."""
    x = x_nhwc.astype(jnp.float32)
    Cin = x.shape[-1]
    dw_hwio = w_dw.reshape(3, 3, 1, Cin)
    y = lax.conv_general_dilated(
        x, dw_hwio, (1, 1), 'SAME',
        dimension_numbers=('NHWC', 'HWIO', 'NHWC'),
        feature_group_count=Cin)
    y = y * s1 + b1
    pw = w_pw.reshape(1, 1, w_pw.shape[0], w_pw.shape[1])
    z = lax.conv_general_dilated(
        y, pw, (1, 1), 'VALID',
        dimension_numbers=('NHWC', 'HWIO', 'NHWC'))
    return z * s2 + b2


def _fold_bn(gamma, beta, mean, var, eps=1e-5):
    scale = gamma / jnp.sqrt(var + eps)
    shift = beta - mean * scale
    return scale.astype(jnp.float32), shift.astype(jnp.float32)


if __name__ == "__main__":
    N, Cin, Cout, H, W = 2, 4, 8, 16, 16

    key = jax.random.PRNGKey(0)
    keys = jax.random.split(key, 12)

    x = jax.random.normal(keys[0], (N, H, W, Cin), jnp.float32)        # NHWC activations

    # conv1 depthwise weight (PyTorch (Cin,1,3,3)) -> kernel layout (3,3,Cin)
    w_dw = 0.2 * jax.random.normal(keys[1], (3, 3, Cin), jnp.float32)
    # conv2 pointwise weight (PyTorch (Cout,Cin,1,1)) -> kernel layout (Cin,Cout)
    w_pw = 0.2 * jax.random.normal(keys[2], (Cin, Cout), jnp.float32)

    # BatchNorm2d(in_channels) parameters / running stats
    g1 = 1.0 + 0.1 * jax.random.normal(keys[3], (Cin,), jnp.float32)
    be1 = 0.1 * jax.random.normal(keys[4], (Cin,), jnp.float32)
    rm1 = 0.1 * jax.random.normal(keys[5], (Cin,), jnp.float32)
    rv1 = jax.random.uniform(keys[6], (Cin,), jnp.float32, 0.5, 1.5)

    # BatchNorm2d(out_channels) parameters / running stats
    g2 = 1.0 + 0.1 * jax.random.normal(keys[7], (Cout,), jnp.float32)
    be2 = 0.1 * jax.random.normal(keys[8], (Cout,), jnp.float32)
    rm2 = 0.1 * jax.random.normal(keys[9], (Cout,), jnp.float32)
    rv2 = jax.random.uniform(keys[10], (Cout,), jnp.float32, 0.5, 1.5)

    s1, b1 = _fold_bn(g1, be1, rm1, rv1)
    s2, b2 = _fold_bn(g2, be2, rm2, rv2)

    ref = jax.block_until_ready(sep_conv_ref_nhwc(x, w_dw, w_pw, s1, b1, s2, b2))

    checks = [
        # 1) default blocking (whole image per strip, >= 2 parallel grid steps)
        ("default", sep_conv_nhwc(x, w_dw, w_pw, s1, b1, s2, b2), 5e-2),
        # 2) explicit multi-strip tiling -> exercises the halo-row + roll path
        ("strips", sep_conv_nhwc(x, w_dw, w_pw, s1, b1, s2, b2,
                                 strip_rows=4, batch_block=1), 5e-2),
        # 3) lane-dense padded-Cout path (forced; auto rule only pads when Cout >= 128)
        ("pad_cout", sep_conv_nhwc(x, w_dw, w_pw, s1, b1, s2, b2, cout_pad_to=128), 5e-2),
        # 4) bf16 activations in / bf16 out (halves HBM traffic on the mem-bound path)
        ("bf16_io", sep_conv_nhwc(x.astype(jnp.bfloat16), w_dw, w_pw, s1, b1, s2, b2),
         1.5e-1),
    ]

    for name, out, tol in checks:
        out = jax.block_until_ready(out)
        assert out.shape == (N, H, W, Cout), (name, out.shape)
        err = float(jnp.max(jnp.abs(out.astype(jnp.float32) - ref)))
        if err > tol:
            raise AssertionError(f"{name}: mismatch vs reference, max abs err = {err}")

    # 5) NCHW module-interface adapter (parity with the PyTorch SepConv signature)
    x_nchw = jnp.transpose(x, (0, 3, 1, 2))
    out_nchw = jax.block_until_ready(sep_conv(x_nchw, w_dw, w_pw, s1, b1, s2, b2))
    assert out_nchw.shape == (N, Cout, H, W)
    ref_nchw = jnp.transpose(ref, (0, 3, 1, 2))
    err = float(jnp.max(jnp.abs(out_nchw - ref_nchw)))
    if err > 5e-2:
        raise AssertionError(f"nchw adapter: mismatch vs reference, max abs err = {err}")

    print("KERNEL_OK")
</pallas_src>

<mosaic_0001>
module attributes {stable_mosaic.version = 11 : i64} {
  func.func @_sepconv_kernel(%arg0: i32, %arg1: i32, %arg2: memref<1x16x16x4xf32, #tpu.memory_space<vmem>>, %arg3: memref<1x1x16x4xf32, #tpu.memory_space<vmem>>, %arg4: memref<1x1x16x4xf32, #tpu.memory_space<vmem>>, %arg5: memref<3x3x4xf32, #tpu.memory_space<vmem>>, %arg6: memref<4x8xbf16, #tpu.memory_space<vmem>>, %arg7: memref<1x8xf32, #tpu.memory_space<vmem>>, %arg8: memref<1x16x16x8xf32, #tpu.memory_space<vmem>>) attributes {dimension_semantics = [#tpu.dimension_semantics<parallel>, #tpu.dimension_semantics<parallel>], iteration_bounds = array<i64: 2, 1>, scalar_prefetch = 0 : i64, scratch_operands = 0 : i64, tpu.core_type = #tpu.core_type<tc>, window_params = [{transform_indices = @transform_0, window_bounds = array<i64: 1, 16, 16, 4>}, {transform_indices = @transform_1, window_bounds = array<i64: 1, 1, 16, 4>}, {transform_indices = @transform_2, window_bounds = array<i64: 1, 1, 16, 4>}, {pipeline_mode = #tpu.pipeline_mode<synchronous>, transform_indices = @transform_3, window_bounds = array<i64: 3, 3, 4>}, {pipeline_mode = #tpu.pipeline_mode<synchronous>, transform_indices = @transform_4, window_bounds = array<i64: 4, 8>}, {pipeline_mode = #tpu.pipeline_mode<synchronous>, transform_indices = @transform_5, window_bounds = array<i64: 1, 8>}, {transform_indices = @transform_6, window_bounds = array<i64: 1, 16, 16, 8>}]} {
    %0 = tpu.iota {dimensions = array<i32: 2>} : vector<1x1x16x1xi32>
    %c0_i32 = arith.constant 0 : i32
    %1 = vector.broadcast %c0_i32 : i32 to vector<1x1x16x1xi32>
    %2 = arith.cmpi sgt, %0, %1 : vector<1x1x16x1xi32>
    %3 = arith.extui %2 : vector<1x1x16x1xi1> to vector<1x1x16x1xi32>
    %4 = arith.sitofp %3 : vector<1x1x16x1xi32> to vector<1x1x16x1xf32>
    %c15_i32 = arith.constant 15 : i32
    %5 = vector.broadcast %c15_i32 : i32 to vector<1x1x16x1xi32>
    %6 = arith.cmpi slt, %0, %5 : vector<1x1x16x1xi32>
    %7 = arith.extui %6 : vector<1x1x16x1xi1> to vector<1x1x16x1xi32>
    %8 = arith.sitofp %7 : vector<1x1x16x1xi32> to vector<1x1x16x1xf32>
    %c0 = arith.constant 0 : index
    %c0_0 = arith.constant 0 : index
    %c0_1 = arith.constant 0 : index
    %9 = vector.load %arg5[%c0, %c0_0, %c0_1] : memref<3x3x4xf32, #tpu.memory_space<vmem>>, vector<3x3x4xf32>
    %c0_2 = arith.constant 0 : index
    %c0_3 = arith.constant 0 : index
    %c0_4 = arith.constant 0 : index
    %c0_5 = arith.constant 0 : index
    %10 = vector.load %arg2[%c0_2, %c0_3, %c0_4, %c0_5] : memref<1x16x16x4xf32, #tpu.memory_space<vmem>>, vector<1x16x16x4xf32>
    %c0_6 = arith.constant 0 : index
    %c0_7 = arith.constant 0 : index
    %c0_8 = arith.constant 0 : index
    %c0_9 = arith.constant 0 : index
    %11 = vector.load %arg3[%c0_6, %c0_7, %c0_8, %c0_9] : memref<1x1x16x4xf32, #tpu.memory_space<vmem>>, vector<1x1x16x4xf32>
    %c0_i32_10 = arith.constant 0 : i32
    %12 = arith.cmpi ne, %arg1, %c0_i32_10 : i32
    %13 = arith.extui %12 : i1 to i32
    %14 = arith.sitofp %13 : i32 to f32
    %15 = vector.broadcast %14 : f32 to vector<1x1x16x4xf32>
    %16 = arith.mulf %11, %15 : vector<1x1x16x4xf32>
    %c0_11 = arith.constant 0 : index
    %c0_12 = arith.constant 0 : index
    %c0_13 = arith.constant 0 : index
    %c0_14 = arith.constant 0 : index
    %17 = vector.load %arg4[%c0_11, %c0_12, %c0_13, %c0_14] : memref<1x1x16x4xf32, #tpu.memory_space<vmem>>, vector<1x1x16x4xf32>
    %c0_i32_15 = arith.constant 0 : i32
    %18 = arith.cmpi ne, %arg1, %c0_i32_15 : i32
    %19 = arith.extui %18 : i1 to i32
    %20 = arith.sitofp %19 : i32 to f32
    %21 = vector.broadcast %20 : f32 to vector<1x1x16x4xf32>
    %22 = arith.mulf %17, %21 : vector<1x1x16x4xf32>
    %c1_i32 = arith.constant 1 : i32
    %23 = tpu.dynamic_rotate %10 by %c1_i32 dim 2 : vector<1x16x16x4xf32>, i32 -> vector<1x16x16x4xf32>
    %24 = vector.broadcast %4 : vector<1x1x16x1xf32> to vector<1x16x16x4xf32>
    %25 = arith.mulf %23, %24 : vector<1x16x16x4xf32>
    %c15_i32_16 = arith.constant 15 : i32
    %26 = tpu.dynamic_rotate %10 by %c15_i32_16 dim 2 : vector<1x16x16x4xf32>, i32 -> vector<1x16x16x4xf32>
    %27 = vector.broadcast %8 : vector<1x1x16x1xf32> to vector<1x16x16x4xf32>
    %28 = arith.mulf %26, %27 : vector<1x16x16x4xf32>
    %29 = vector.extract_strided_slice %9 {offsets = [0, 0, 0], sizes = [1, 1, 4], strides = [1, 1, 1]} : vector<3x3x4xf32> to vector<1x1x4xf32>
    %30 = vector.shape_cast %29 : vector<1x1x4xf32> to vector<4xf32>
    %31 = vector.shape_cast %30 : vector<4xf32> to vector<1x1x1x4xf32>
    %32 = vector.broadcast %31 : vector<1x1x1x4xf32> to vector<1x16x16x4xf32>
    %33 = arith.mulf %25, %32 : vector<1x16x16x4xf32>
    %34 = vector.extract_strided_slice %9 {offsets = [0, 1, 0], sizes = [1, 1, 4], strides = [1, 1, 1]} : vector<3x3x4xf32> to vector<1x1x4xf32>
    %35 = vector.shape_cast %34 : vector<1x1x4xf32> to vector<4xf32>
    %36 = vector.shape_cast %35 : vector<4xf32> to vector<1x1x1x4xf32>
    %37 = vector.broadcast %36 : vector<1x1x1x4xf32> to vector<1x16x16x4xf32>
    %38 = arith.mulf %10, %37 : vector<1x16x16x4xf32>
    %39 = arith.addf %33, %38 : vector<1x16x16x4xf32>
    %40 = vector.extract_strided_slice %9 {offsets = [0, 2, 0], sizes = [1, 1, 4], strides = [1, 1, 1]} : vector<3x3x4xf32> to vector<1x1x4xf32>
    %41 = vector.shape_cast %40 : vector<1x1x4xf32> to vector<4xf32>
    %42 = vector.shape_cast %41 : vector<4xf32> to vector<1x1x1x4xf32>
    %43 = vector.broadcast %42 : vector<1x1x1x4xf32> to vector<1x16x16x4xf32>
    %44 = arith.mulf %28, %43 : vector<1x16x16x4xf32>
    %45 = arith.addf %39, %44 : vector<1x16x16x4xf32>
    %c1_i32_17 = arith.constant 1 : i32
    %46 = tpu.dynamic_rotate %10 by %c1_i32_17 dim 2 : vector<1x16x16x4xf32>, i32 -> vector<1x16x16x4xf32>
    %47 = vector.broadcast %4 : vector<1x1x16x1xf32> to vector<1x16x16x4xf32>
    %48 = arith.mulf %46, %47 : vector<1x16x16x4xf32>
    %c15_i32_18 = arith.constant 15 : i32
    %49 = tpu.dynamic_rotate %10 by %c15_i32_18 dim 2 : vector<1x16x16x4xf32>, i32 -> vector<1x16x16x4xf32>
    %50 = vector.broadcast %8 : vector<1x1x16x1xf32> to vector<1x16x16x4xf32>
    %51 = arith.mulf %49, %50 : vector<1x16x16x4xf32>
    %52 = vector.extract_strided_slice %9 {offsets = [1, 0, 0], sizes = [1, 1, 4], strides = [1, 1, 1]} : vector<3x3x4xf32> to vector<1x1x4xf32>
    %53 = vector.shape_cast %52 : vector<1x1x4xf32> to vector<4xf32>
    %54 = vector.shape_cast %53 : vector<4xf32> to vector<1x1x1x4xf32>
    %55 = vector.broadcast %54 : vector<1x1x1x4xf32> to vector<1x16x16x4xf32>
    %56 = arith.mulf %48, %55 : vector<1x16x16x4xf32>
    %57 = vector.extract_strided_slice %9 {offsets = [1, 1, 0], sizes = [1, 1, 4], strides = [1, 1, 1]} : vector<3x3x4xf32> to vector<1x1x4xf32>
    %58 = vector.shape_cast %57 : vector<1x1x4xf32> to vector<4xf32>
    %59 = vector.shape_cast %58 : vector<4xf32> to vector<1x1x1x4xf32>
    %60 = vector.broadcast %59 : vector<1x1x1x4xf32> to vector<1x16x16x4xf32>
    %61 = arith.mulf %10, %60 : vector<1x16x16x4xf32>
    %62 = arith.addf %56, %61 : vector<1x16x16x4xf32>
    %63 = vector.extract_strided_slice %9 {offsets = [1, 2, 0], sizes = [1, 1, 4], strides = [1, 1, 1]} : vector<3x3x4xf32> to vector<1x1x4xf32>
    %64 = vector.shape_cast %63 : vector<1x1x4xf32> to vector<4xf32>
    %65 = vector.shape_cast %64 : vector<4xf32> to vector<1x1x1x4xf32>
    %66 = vector.broadcast %65 : vector<1x1x1x4xf32> to vector<1x16x16x4xf32>
    %67 = arith.mulf %51, %66 : vector<1x16x16x4xf32>
    %68 = arith.addf %62, %67 : vector<1x16x16x4xf32>
    %c1_i32_19 = arith.constant 1 : i32
    %69 = tpu.dynamic_rotate %10 by %c1_i32_19 dim 2 : vector<1x16x16x4xf32>, i32 -> vector<1x16x16x4xf32>
    %70 = vector.broadcast %4 : vector<1x1x16x1xf32> to vector<1x16x16x4xf32>
    %71 = arith.mulf %69, %70 : vector<1x16x16x4xf32>
    %c15_i32_20 = arith.constant 15 : i32
    %72 = tpu.dynamic_rotate %10 by %c15_i32_20 dim 2 : vector<1x16x16x4xf32>, i32 -> vector<1x16x16x4xf32>
    %73 = vector.broadcast %8 : vector<1x1x16x1xf32> to vector<1x16x16x4xf32>
    %74 = arith.mulf %72, %73 : vector<1x16x16x4xf32>
    %75 = vector.extract_strided_slice %9 {offsets = [2, 0, 0], sizes = [1, 1, 4], strides = [1, 1, 1]} : vector<3x3x4xf32> to vector<1x1x4xf32>
    %76 = vector.shape_cast %75 : vector<1x1x4xf32> to vector<4xf32>
    %77 = vector.shape_cast %76 : vector<4xf32> to vector<1x1x1x4xf32>
    %78 = vector.broadcast %77 : vector<1x1x1x4xf32> to vector<1x16x16x4xf32>
    %79 = arith.mulf %71, %78 : vector<1x16x16x4xf32>
    %80 = vector.extract_strided_slice %9 {offsets = [2, 1, 0], sizes = [1, 1, 4], strides = [1, 1, 1]} : vector<3x3x4xf32> to vector<1x1x4xf32>
    %81 = vector.shape_cast %80 : vector<1x1x4xf32> to vector<4xf32>
    %82 = vector.shape_cast %81 : vector<4xf32> to vector<1x1x1x4xf32>
    %83 = vector.broadcast %82 : vector<1x1x1x4xf32> to vector<1x16x16x4xf32>
    %84 = arith.mulf %10, %83 : vector<1x16x16x4xf32>
    %85 = arith.addf %79, %84 : vector<1x16x16x4xf32>
    %86 = vector.extract_strided_slice %9 {offsets = [2, 2, 0], sizes = [1, 1, 4], strides = [1, 1, 1]} : vector<3x3x4xf32> to vector<1x1x4xf32>
    %87 = vector.shape_cast %86 : vector<1x1x4xf32> to vector<4xf32>
    %88 = vector.shape_cast %87 : vector<4xf32> to vector<1x1x1x4xf32>
    %89 = vector.broadcast %88 : vector<1x1x1x4xf32> to vector<1x16x16x4xf32>
    %90 = arith.mulf %74, %89 : vector<1x16x16x4xf32>
    %91 = arith.addf %85, %90 : vector<1x16x16x4xf32>
    %c1_i32_21 = arith.constant 1 : i32
    %92 = tpu.dynamic_rotate %16 by %c1_i32_21 dim 2 : vector<1x1x16x4xf32>, i32 -> vector<1x1x16x4xf32>
    %93 = vector.broadcast %4 : vector<1x1x16x1xf32> to vector<1x1x16x4xf32>
    %94 = arith.mulf %92, %93 : vector<1x1x16x4xf32>
    %c15_i32_22 = arith.constant 15 : i32
    %95 = tpu.dynamic_rotate %16 by %c15_i32_22 dim 2 : vector<1x1x16x4xf32>, i32 -> vector<1x1x16x4xf32>
    %96 = vector.broadcast %8 : vector<1x1x16x1xf32> to vector<1x1x16x4xf32>
    %97 = arith.mulf %95, %96 : vector<1x1x16x4xf32>
    %98 = vector.extract_strided_slice %9 {offsets = [0, 0, 0], sizes = [1, 1, 4], strides = [1, 1, 1]} : vector<3x3x4xf32> to vector<1x1x4xf32>
    %99 = vector.shape_cast %98 : vector<1x1x4xf32> to vector<4xf32>
    %100 = vector.shape_cast %99 : vector<4xf32> to vector<1x1x1x4xf32>
    %101 = vector.broadcast %100 : vector<1x1x1x4xf32> to vector<1x1x16x4xf32>
    %102 = arith.mulf %94, %101 : vector<1x1x16x4xf32>
    %103 = vector.extract_strided_slice %9 {offsets = [0, 1, 0], sizes = [1, 1, 4], strides = [1, 1, 1]} : vector<3x3x4xf32> to vector<1x1x4xf32>
    %104 = vector.shape_cast %103 : vector<1x1x4xf32> to vector<4xf32>
    %105 = vector.shape_cast %104 : vector<4xf32> to vector<1x1x1x4xf32>
    %106 = vector.broadcast %105 : vector<1x1x1x4xf32> to vector<1x1x16x4xf32>
    %107 = arith.mulf %16, %106 : vector<1x1x16x4xf32>
    %108 = arith.addf %102, %107 : vector<1x1x16x4xf32>
    %109 = vector.extract_strided_slice %9 {offsets = [0, 2, 0], sizes = [1, 1, 4], strides = [1, 1, 1]} : vector<3x3x4xf32> to vector<1x1x4xf32>
    %110 = vector.shape_cast %109 : vector<1x1x4xf32> to vector<4xf32>
    %111 = vector.shape_cast %110 : vector<4xf32> to vector<1x1x1x4xf32>
    %112 = vector.broadcast %111 : vector<1x1x1x4xf32> to vector<1x1x16x4xf32>
    %113 = arith.mulf %97, %112 : vector<1x1x16x4xf32>
    %114 = arith.addf %108, %113 : vector<1x1x16x4xf32>
    %c1_i32_23 = arith.constant 1 : i32
    %115 = tpu.dynamic_rotate %22 by %c1_i32_23 dim 2 : vector<1x1x16x4xf32>, i32 -> vector<1x1x16x4xf32>
    %116 = vector.broadcast %4 : vector<1x1x16x1xf32> to vector<1x1x16x4xf32>
    %117 = arith.mulf %115, %116 : vector<1x1x16x4xf32>
    %c15_i32_24 = arith.constant 15 : i32
    %118 = tpu.dynamic_rotate %22 by %c15_i32_24 dim 2 : vector<1x1x16x4xf32>, i32 -> vector<1x1x16x4xf32>
    %119 = vector.broadcast %8 : vector<1x1x16x1xf32> to vector<1x1x16x4xf32>
    %120 = arith.mulf %118, %119 : vector<1x1x16x4xf32>
    %121 = vector.extract_strided_slice %9 {offsets = [2, 0, 0], sizes = [1, 1, 4], strides = [1, 1, 1]} : vector<3x3x4xf32> to vector<1x1x4xf32>
    %122 = vector.shape_cast %121 : vector<1x1x4xf32> to vector<4xf32>
    %123 = vector.shape_cast %122 : vector<4xf32> to vector<1x1x1x4xf32>
    %124 = vector.broadcast %123 : vector<1x1x1x4xf32> to vector<1x1x16x4xf32>
    %125 = arith.mulf %117, %124 : vector<1x1x16x4xf32>
    %126 = vector.extract_strided_slice %9 {offsets = [2, 1, 0], sizes = [1, 1, 4], strides = [1, 1, 1]} : vector<3x3x4xf32> to vector<1x1x4xf32>
    %127 = vector.shape_cast %126 : vector<1x1x4xf32> to vector<4xf32>
    %128 = vector.shape_cast %127 : vector<4xf32> to vector<1x1x1x4xf32>
    %129 = vector.broadcast %128 : vector<1x1x1x4xf32> to vector<1x1x16x4xf32>
    %130 = arith.mulf %22, %129 : vector<1x1x16x4xf32>
    %131 = arith.addf %125, %130 : vector<1x1x16x4xf32>
    %132 = vector.extract_strided_slice %9 {offsets = [2, 2, 0], sizes = [1, 1, 4], strides = [1, 1, 1]} : vector<3x3x4xf32> to vector<1x1x4xf32>
    %133 = vector.shape_cast %132 : vector<1x1x4xf32> to vector<4xf32>
    %134 = vector.shape_cast %133 : vector<4xf32> to vector<1x1x1x4xf32>
    %135 = vector.broadcast %134 : vector<1x1x1x4xf32> to vector<1x1x16x4xf32>
    %136 = arith.mulf %120, %135 : vector<1x1x16x4xf32>
    %137 = arith.addf %131, %136 : vector<1x1x16x4xf32>
    %138 = vector.extract_strided_slice %45 {offsets = [0, 0, 0, 0], sizes = [1, 15, 16, 4], strides = [1, 1, 1, 1]} : vector<1x16x16x4xf32> to vector<1x15x16x4xf32>
    %139 = tpu.concatenate %114, %138 in 1 : vector<1x1x16x4xf32>, vector<1x15x16x4xf32> -> vector<1x16x16x4xf32>
    %140 = vector.extract_strided_slice %91 {offsets = [0, 1, 0, 0], sizes = [1, 15, 16, 4], strides = [1, 1, 1, 1]} : vector<1x16x16x4xf32> to vector<1x15x16x4xf32>
    %141 = tpu.concatenate %140, %137 in 1 : vector<1x15x16x4xf32>, vector<1x1x16x4xf32> -> vector<1x16x16x4xf32>
    %142 = arith.addf %68, %139 : vector<1x16x16x4xf32>
    %143 = arith.addf %142, %141 : vector<1x16x16x4xf32>
    %144 = arith.truncf %143 : vector<1x16x16x4xf32> to vector<1x16x16x4xbf16>
    %145 = vector.shape_cast %144 : vector<1x16x16x4xbf16> to vector<256x4xbf16>
    %c0_25 = arith.constant 0 : index
    %c0_26 = arith.constant 0 : index
    %146 = vector.load %arg6[%c0_25, %c0_26] : memref<4x8xbf16, #tpu.memory_space<vmem>>, vector<4x8xbf16>
    %cst = arith.constant dense<0.000000e+00> : vector<256x8xf32>
    %147 = tpu.matmul %145, %146, %cst {dimension_numbers = #tpu.dot_dimension_numbers<[1], [0], [0], [1], [0, 0, 1, 1], [], []>} : vector<256x4xbf16>, vector<4x8xbf16>, vector<256x8xf32> -> vector<256x8xf32>
    %c0_27 = arith.constant 0 : index
    %c0_28 = arith.constant 0 : index
    %148 = vector.load %arg7[%c0_27, %c0_28] : memref<1x8xf32, #tpu.memory_space<vmem>>, vector<1x8xf32>
    %149 = vector.broadcast %148 : vector<1x8xf32> to vector<256x8xf32>
    %150 = arith.addf %147, %149 : vector<256x8xf32>
    %151 = vector.shape_cast %150 : vector<256x8xf32> to vector<1x16x16x8xf32>
    %c0_29 = arith.constant 0 : index
    %c0_30 = arith.constant 0 : index
    %c0_31 = arith.constant 0 : index
    %c0_32 = arith.constant 0 : index
    %152 = vector.load %arg8[%c0_29, %c0_30, %c0_31, %c0_32] : memref<1x16x16x8xf32, #tpu.memory_space<vmem>>, vector<1x16x16x8xf32>
    tpu.vector_store %arg8[%c0_29, %c0_30, %c0_31, %c0_32], %151 {strides = array<i32>} : memref<1x16x16x8xf32, #tpu.memory_space<vmem>>, vector<1x16x16x8xf32>,
    return
  }
  func.func @transform_0(%arg0: i32, %arg1: i32) -> (i32, i32, i32, i32) {
    %c0_i32 = arith.constant 0 : i32
    %c0_i32_0 = arith.constant 0 : i32
    %c0_i32_1 = arith.constant 0 : i32
    return %arg0, %arg1, %c0_i32, %c0_i32_0 : i32, i32, i32, i32
  }
  func.func @transform_1(%arg0: i32, %arg1: i32) -> (i32, i32, i32, i32) {
    %c16_i32 = arith.constant 16 : i32
    %0 = arith.muli %arg1, %c16_i32 : i32
    %c1_i32 = arith.constant 1 : i32
    %1 = arith.subi %0, %c1_i32 : i32
    %c0_i32 = arith.constant 0 : i32
    %2 = arith.maxsi %1, %c0_i32 : i32
    %c0_i32_0 = arith.constant 0 : i32
    %c0_i32_1 = arith.constant 0 : i32
    %c0_i32_2 = arith.constant 0 : i32
    return %arg0, %2, %c0_i32_0, %c0_i32_1 : i32, i32, i32, i32
  }
  func.func @transform_2(%arg0: i32, %arg1: i32) -> (i32, i32, i32, i32) {
    %c1_i32 = arith.constant 1 : i32
    %0 = arith.addi %arg1, %c1_i32 : i32
    %c16_i32 = arith.constant 16 : i32
    %1 = arith.muli %0, %c16_i32 : i32
    %c15_i32 = arith.constant 15 : i32
    %2 = arith.minsi %1, %c15_i32 : i32
    %c0_i32 = arith.constant 0 : i32
    %c0_i32_0 = arith.constant 0 : i32
    %c0_i32_1 = arith.constant 0 : i32
    return %arg0, %2, %c0_i32, %c0_i32_0 : i32, i32, i32, i32
  }
  func.func @transform_3(%arg0: i32, %arg1: i32) -> (i32, i32, i32) {
    %c0_i32 = arith.constant 0 : i32
    %c0_i32_0 = arith.constant 0 : i32
    %c0_i32_1 = arith.constant 0 : i32
    %c0_i32_2 = arith.constant 0 : i32
    return %c0_i32, %c0_i32_0, %c0_i32_1 : i32, i32, i32
  }
  func.func @transform_4(%arg0: i32, %arg1: i32) -> (i32, i32) {
    %c0_i32 = arith.constant 0 : i32
    %c0_i32_0 = arith.constant 0 : i32
    %c0_i32_1 = arith.constant 0 : i32
    return %c0_i32, %c0_i32_0 : i32, i32
  }
  func.func @transform_5(%arg0: i32, %arg1: i32) -> (i32, i32) {
    %c0_i32 = arith.constant 0 : i32
    %c0_i32_0 = arith.constant 0 : i32
    %c0_i32_1 = arith.constant 0 : i32
    return %c0_i32, %c0_i32_0 : i32, i32
  }
  func.func @transform_6(%arg0: i32, %arg1: i32) -> (i32, i32, i32, i32) {
    %c0_i32 = arith.constant 0 : i32
    %c0_i32_0 = arith.constant 0 : i32
    %c0_i32_1 = arith.constant 0 : i32
    return %arg0, %arg1, %c0_i32, %c0_i32_0 : i32, i32, i32, i32
  }
}

</mosaic_0001>

<bundles_post_ra>
// kernel: tpu_custom_call.1
= control target key start
LH: loop header
LB: loop body
LE: loop exit
PB: predicated region body
PF: predicated region fallthrough
CT: control target
= control target key end

     0   :  { %s1874_s21 = smov 0   ;;  %s1876_s22 = smov 0   ;;  %s3094_s0 = inlined_call_operand.vmem [shape: f32[2,16,16,4], index: 0, kind: input, shape index: {}]   ;;  %s3095_s1 = inlined_call_operand.vmem [shape: f32[2,16,16,4], index: 1, kind: input, shape index: {}]   ;;  %s3096_s2 = inlined_call_operand.vmem [shape: f32[2,16,16,4], index: 2, kind: input, shape index: {}]   ;;  %s3097_s3 = inlined_call_operand.vmem [shape: f32[3,3,4], index: 3, kind: input, shape index: {}]   ;;  %s3098_s4 = inlined_call_operand.vmem [shape: bf16[4,8], index: 4, kind: input, shape index: {}]   ;;  %s3099_s5 = inlined_call_operand.vmem [shape: f32[1,8], index: 5, kind: input, shape index: {}]   ;;  %s3100_s6 = inlined_call_operand.vmem [shape: f32[2,16,16,8], index: 6, kind: output, shape index: {}]  }
   0x1   :  { %s1878_s23 = smov 0  }
   0x2 LB: > { %s28_s24 = sadd.s32 1, %s1832_s22  ;;  %p1694_p0 = scmp.ge.s32.totalorder %s1836_s23, 1  ;;  %s1836_s23 = sphi %s1878_s23, %s16_s23   ;;  %s1832_s22 = sphi %s1876_s22, %s3132_s22   ;;  %s1828_s21 = sphi %s1874_s21, %s3131_s21  }
   0x3   : > { %p30_p1 = scmp.ge.s32.totalorder %s28_s24, 2  ;;  %p298_p2 = scmp.lt.s32.totalorder %s1836_s23, 3 }
   0x5   : > { %s3134_s24 = smov (%p30_p1, %s28_s24), 0  ;;  %p299_p3 = pnand %p1694_p0, %p298_p2 }
   0x7   : > { %302 = sbr.rel (%p299_p3) target bundleno = 434 (0x1b2), region = 44 }
   0xe   : > { %v1297_v0 = vld [vmem:[%s3098_s4] sm:$0x3]  ;;  %vm1354_vm0 = vcmask 1041408   ;;  %p365_p4 = scmp.lt.s32.totalorder %s1828_s21, 1  ;;  %v421_v1 = vlaneseq  ;;  %v1838_v6 = vmov 0.0   ;;  %vm1305_vm5 = vcmask 31744  }
   0xf   : > { %1784 = vmatprep.subr.msk.bf16.mxu1 %vm1354_vm0, %v1297_v0  ;;  %v1356_v2 = vsel %vm1354_vm0, %v1297_v0, 0  ;;  %1783 = vmatprep.subr.msk.bf16.mxu0 %vm1354_vm0, %v1297_v0  ;;  %v436_v5 = vld [vmem:[%s3097_s3] sm:$0x7]  ;;  %v437_v41 = vld [vmem:[%s3097_s3 + $0x4] sm:$0x7]  ;;  %vm1519_vm6 = vcmask 64512  }
  0x10   : > { %1782 = vmatpush3.bf16.msra.mxu1 %v1356_v2  ;;  %1748 = vmatpush3.bf16.msra.mxu0 %v1356_v2  ;;  %s3136_s21 = smov (!%p365_p4, %s1828_s21), 1  ;;  %v1895_v3 = vshrl.u32 %v421_v1, 7  ;;  %v438_v46 = vld [vmem:[%s3097_s3 + $0x8] sm:$0x7] }
  0x11   : > { %s1897_s27 = sshll.u32 %s3136_s21, 8 }
  0x12   : > { %v423_v4 = vadd.s32 8, %v1895_v3  ;;  %vm424_vm1 = vcmp.gt.s32.totalorder %v1895_v3, 0  ;;  %s1908_s8 = scalar_lea.vmem %s3094_s0, %s1897_s27  ;;  %vm515_vm2 = vcmp.lt.s32.totalorder %v1895_v3, 1  ;;  %vm612_vm3 = vcmp.lt.s32.totalorder %v1895_v3, 7  ;;  %s387_s15 = scalar_lea.vmem %s3095_s1, %s1897_s27 }
  0x13   : > { %v1910_v7 = vsel %vm424_vm1, 1.0, %v1838_v6  ;;  %v679_v8 = vsub.s32 0, %v1895_v3  ;;  %v453_v9 = vld [vmem:[%s1908_s8 + $0x70] sm:$0xff]  ;;  %v454_v10 = vld [vmem:[%s1908_s8 + $0x78] sm:$0xff]  ;;  %v1918_v11 = vld [vmem:[%s1908_s8 + $0x80] sm:$0xff]  ;;  %v713_v12 = vsub.s32 1, %v1895_v3  ;;  %s2987_s28 = scalar_lea.vmem %s3100_s6, %s1897_s27 }
  0x14   : > { %vm431_vm4 = vcmp.lt.s32.totalorder %v423_v4, 15  ;;  %v777_v13 = vsub.s32 2, %v1895_v3  ;;  %v1925_v15 = vld [vmem:[%s1908_s8 + $0x88] sm:$0xff]  ;;  %v1928_v16 = vld [vmem:[%s1908_s8 + $0x90] sm:$0xff]  ;;  %v1931_v17 = vld [vmem:[%s1908_s8 + $0x98] sm:$0xff]  ;;  %v490_v18 = vrot.slane %v453_v9, 7 }
  0x15   : > { %v1922_v14 = vsel %vm431_vm4, 1.0, %v1838_v6  ;;  %v491_v19 = vrot.slane %v1918_v11, 7  ;;  %v1934_v20 = vrot.slane %v436_v5, %v679_v8  ;;  %v492_v21 = vrot.slane %v1928_v16, 7  ;;  %s1727_s16 = sadd.s32 240, %s1897_s27 }
  0x16   : > { %v506_v22 = vrot.slane %v454_v10, 7  ;;  %v507_v23 = vrot.slane %v1925_v15, 7  ;;  %v508_v24 = vrot.slane %v1931_v17, 7  ;;  %v587_v25 = vrot.slane %v453_v9, 1  ;;  %s404_s19 = scalar_lea.vmem %s3096_s2, %s1727_s16 }
  0x17   : > { %v588_v26 = vrot.slane %v1918_v11, 1  ;;  %v589_v27 = vrot.slane %v1928_v16, 1  ;;  %v603_v28 = vrot.slane %v454_v10, 1  ;;  %v604_v36 = vrot.slane %v1925_v15, 1 }
  0x18   : > { %v1943_v29 = vsel %vm515_vm2, %v490_v18, %v506_v22  ;;  %v1947_v30 = vsel %vm515_vm2, %v491_v19, %v507_v23  ;;  %v525_v31 = vsel %vm515_vm2, %v492_v21, %v508_v24  ;;  %v539_v32 = vsel %vm515_vm2, %v506_v22, %v490_v18 }
  0x19   : > { %3111 = vst [vmem:[#allocation2_spill] sm:$0xff] %v1943_v29  ;;  %3112 = vst [vmem:[#allocation3_spill] sm:$0xff] %v1947_v30  ;;  %v540_v33 = vsel %vm515_vm2, %v507_v23, %v491_v19  ;;  %v541_v34 = vsel %vm515_vm2, %v508_v24, %v492_v21  ;;  %v1958_v35 = vmul.f32 %v1910_v7, %v539_v32  ;;  %v605_v39 = vrot.slane %v1931_v17, 1 }
  0x1a   : > { %v1962_v37 = vmul.f32 %v1910_v7, %v540_v33  ;;  %v1965_v38 = vmul.f32 %v1910_v7, %v541_v34  ;;  %v1970_v40 = vsel %vm612_vm3, %v587_v25, %v603_v28  ;;  %v1977_v42 = vsel %vm612_vm3, %v588_v26, %v604_v36 }
  0x1b   : > { %3113 = vst [vmem:[#allocation4_spill] sm:$0xff] %v1958_v35  ;;  %3115 = vst [vmem:[#allocation6_spill] sm:$0xff] %v1970_v40  ;;  %v636_v43 = vsel %vm612_vm3, %v603_v28, %v587_v25  ;;  %v637_v44 = vsel %vm612_vm3, %v604_v36, %v588_v26  ;;  %v695_v45 = vmul.f32 %v1934_v20, %v1958_v35  ;;  %v2063_v28 = vld [vmem:[%s1908_s8 + $0xa8] sm:$0xff] }
  0x1c   : > { %3114 = vst [vmem:[#allocation5_spill] sm:$0xff] %v1962_v37  ;;  %3116 = vst [vmem:[#allocation7_spill] sm:$0xff] %v1977_v42  ;;  %v622_v47 = vsel %vm612_vm3, %v589_v27, %v605_v39  ;;  %v638_v48 = vsel %vm612_vm3, %v605_v39, %v589_v27  ;;  %v1993_v49 = vmul.f32 %v1922_v14, %v636_v43  ;;  %v2060_v27 = vld [vmem:[%s1908_s8 + $0xa0] sm:$0xff] }
  0x1d   : > { %v1996_v50 = vmul.f32 %v1922_v14, %v637_v44  ;;  %v1999_v51 = vmul.f32 %v1922_v14, %v638_v48  ;;  %v696_v52 = vmul.f32 %v1934_v20, %v1943_v29  ;;  %v2005_v53 = vmul.f32 %v1934_v20, %v1947_v30 }
  0x1e   : > { %3117 = vst [vmem:[#allocation8_spill] sm:$0xff] %v1993_v49  ;;  %v2008_v54 = vmul.f32 %v1934_v20, %v525_v31  ;;  %v2010_v55 = vrot.slane %v436_v5, %v713_v12  ;;  %v2012_v56 = vrot.slane %v436_v5, %v777_v13  ;;  %v2014_v57 = vrot.slane %v437_v41, %v679_v8 }
  0x1f   : > { %3118 = vst [vmem:[#allocation9_spill] sm:$0xff] %v1996_v50  ;;  %v2016_v58 = vrot.slane %v437_v41, %v713_v12  ;;  %v2018_v59 = vrot.slane %v437_v41, %v777_v13  ;;  %v2020_v60 = vrot.slane %v438_v46, %v679_v8  ;;  %v2022_v61 = vrot.slane %v438_v46, %v713_v12 }
  0x20   : > { %v2024_v62 = vrot.slane %v438_v46, %v777_v13  ;;  %v729_v63 = vmul.f32 %v2010_v55, %v453_v9  ;;  %v730_v0 = vmul.f32 %v2010_v55, %v454_v10  ;;  %v793_v1 = vmul.f32 %v2012_v56, %v1970_v40 }
  0x21   : > { %v794_v2 = vmul.f32 %v2012_v56, %v1993_v49  ;;  %v795_v4 = vmul.f32 %v2012_v56, %v1977_v42  ;;  %v2035_v5 = vmul.f32 %v2012_v56, %v622_v47  ;;  %v2039_v6 = vmul.f32 %v2014_v57, %v1943_v29 }
  0x22   : > { %v859_v8 = vmul.f32 %v2014_v57, %v1962_v37  ;;  %v759_v9 = vadd.f32 %v729_v63, %v695_v45  ;;  %v760_v10 = vadd.f32 %v730_v0, %v696_v52  ;;  %v860_v12 = vmul.f32 %v2014_v57, %v1947_v30 }
  0x23   : > { %3119 = vst [vmem:[#allocation10_spill] sm:$0xff] %v2039_v6  ;;  %v862_v13 = vmul.f32 %v2014_v57, %v525_v31  ;;  %v895_v18 = vmul.f32 %v2016_v58, %v1918_v11  ;;  %v896_v19 = vmul.f32 %v2016_v58, %v1925_v15  ;;  %v2052_v21 = vmul.f32 %v2018_v59, %v1970_v40 }
  0x24   : > { %v963_v22 = vmul.f32 %v2018_v59, %v1977_v42  ;;  %v823_v23 = vadd.f32 %v793_v1, %v759_v9  ;;  %v824_v24 = vadd.f32 %v794_v2, %v760_v10  ;;  %v964_v25 = vmul.f32 %v2018_v59, %v1996_v50 }
  0x25   : > { %3120 = vst [vmem:[#allocation11_spill] sm:$0xff] %v2052_v21  ;;  %v965_v26 = vmul.f32 %v2018_v59, %v622_v47  ;;  %v927_v32 = vadd.f32 %v895_v18, %v859_v8  ;;  %v928_v33 = vadd.f32 %v896_v19, %v860_v12  ;;  %v1031_v34 = vmul.f32 %v2020_v60, %v1965_v38 }
  0x26   : > { %v1032_v36 = vmul.f32 %v2020_v60, %v525_v31  ;;  %v1065_v39 = vmul.f32 %v2022_v61, %v1928_v16  ;;  %v1066_v41 = vmul.f32 %v2022_v61, %v1931_v17  ;;  %v1129_v43 = vmul.f32 %v2024_v62, %v622_v47 }
  0x27   : > { %v1130_v44 = vmul.f32 %v2024_v62, %v1999_v51  ;;  %v995_v45 = vadd.f32 %v963_v22, %v927_v32  ;;  %v996_v46 = vadd.f32 %v964_v25, %v928_v33  ;;  %v493_v48 = vrot.slane %v2060_v27, 7 }
  0x28   : > { %v509_v52 = vrot.slane %v2063_v28, 7  ;;  %v1095_v63 = vadd.f32 %v1065_v39, %v1031_v34  ;;  %v1096_v31 = vadd.f32 %v1066_v41, %v1032_v36  ;;  %v590_v0 = vrot.slane %v2060_v27, 1 }
  0x29   : > { %v606_v1 = vrot.slane %v2063_v28, 1  ;;  %v1233_v2 = vadd.f32 %v995_v45, %v823_v23  ;;  %v1234_v8 = vadd.f32 %v996_v46, %v824_v24  ;;  %v697_v23 = vmul.f32 %v1934_v20, %v1962_v37  ;;  %v2223_v37 = vld [vmem:[%s1908_s8 + $0x20] sm:$0xff] }
  0x2a   : > { %v2081_v47 = vsel %vm515_vm2, %v493_v48, %v509_v52  ;;  %v542_v9 = vsel %vm515_vm2, %v509_v52, %v493_v48  ;;  %v1159_v10 = vadd.f32 %v1129_v43, %v1095_v63  ;;  %v1160_v12 = vadd.f32 %v1130_v44, %v1096_v31  ;;  %v472_v48 = vld [vmem:[%s387_s15 + $0x8] sm:$0xff] }
  0x2b   : > { %v2086_v18 = vmul.f32 %v1910_v7, %v542_v9  ;;  %v2090_v19 = vsel %vm612_vm3, %v590_v0, %v606_v1  ;;  %v639_v22 = vsel %vm612_vm3, %v606_v1, %v590_v0  ;;  %v731_v24 = vmul.f32 %v2010_v55, %v1918_v11  ;;  %v2123_v1 = vld [vmem:[%s1908_s8] sm:$0xff] }
  0x2c   : > { %v732_v25 = vmul.f32 %v2010_v55, %v1925_v15  ;;  %v1265_v32 = vadd.f32 %v1233_v2, %v1159_v10  ;;  %v1266_v33 = vadd.f32 %v1234_v8, %v1160_v12  ;;  %v2105_v34 = vmul.f32 %v1922_v14, %v639_v22  ;;  %v2136_v12 = vld [vmem:[%s1908_s8 + $0x10] sm:$0xff]  ;;  %v2139_v22 = vld [vmem:[%s1908_s8 + $0x18] sm:$0xff] }
  0x2d   : > { %v796_v36 = vmul.f32 %v2012_v56, %v1996_v50  ;;  %v761_v39 = vadd.f32 %v731_v24, %v697_v23  ;;  %v861_v11 = vmul.f32 %v2014_v57, %v1965_v38  ;;  %v897_v15 = vmul.f32 %v2016_v58, %v1928_v16 }
  0x2e   : > { %v762_v41 = vadd.f32 %v732_v25, %v2005_v53  ;;  %v1289_v43 = vpack.c.bf16 %v1266_v33, %v1265_v32  ;;  %v898_v44 = vmul.f32 %v2016_v58, %v1931_v17  ;;  %v966_v45 = vmul.f32 %v2018_v59, %v1999_v51  ;;  %v471_v53 = vld [vmem:[%s387_s15] sm:$0xff] }
  0x2f   : > { %v1033_v46 = vmul.f32 %v2020_v60, %v2086_v18  ;;  %v825_v52 = vadd.f32 %v795_v4, %v761_v39  ;;  %v929_v31 = vadd.f32 %v897_v15, %v861_v11  ;;  %v1034_v0 = vmul.f32 %v2020_v60, %v2081_v47  ;;  %v2133_v4 = vld [vmem:[%s1908_s8 + $0x8] sm:$0xff] }
  0x30   : > { %v826_v63 = vadd.f32 %v796_v36, %v762_v41  ;;  %1765 = vmatprep.mubr.msk.bf16.mxu1 %vm1305_vm5, %v1289_v43  ;;  %v930_v2 = vadd.f32 %v898_v44, %v862_v13  ;;  %v1067_v8 = vmul.f32 %v2022_v61, %v2060_v27  ;;  %v1068_v9 = vmul.f32 %v2022_v61, %v2063_v28 }
  0x31   : > { %v1131_v10 = vmul.f32 %v2024_v62, %v2090_v19  ;;  %v997_v23 = vadd.f32 %v965_v26, %v929_v31  ;;  %v1132_v24 = vmul.f32 %v2024_v62, %v2105_v34  ;;  %v2143_v13 = vmul.f32 0.0, %v471_v53 }
  0x32   : > { %v2145_v25 = vmul.f32 0.0, %v472_v48  ;;  %v998_v32 = vadd.f32 %v966_v45, %v930_v2  ;;  %v1097_v33 = vadd.f32 %v1067_v8, %v1033_v46  ;;  %v1098_v36 = vadd.f32 %v1068_v9, %v1034_v0 }
  0x33   : > { %v483_v39 = vrot.slane %v2123_v1, 7  ;;  %v1235_v41 = vadd.f32 %v997_v23, %v825_v52  ;;  %v484_v11 = vrot.slane %v2136_v12, 7  ;;  %v499_v15 = vrot.slane %v2133_v4, 7 }
  0x34   : > { %v500_v43 = vrot.slane %v2139_v22, 7  ;;  %v1161_v26 = vadd.f32 %v1131_v10, %v1097_v33  ;;  %v1162_v44 = vadd.f32 %v1132_v24, %v1098_v36  ;;  %v1236_v31 = vadd.f32 %v998_v32, %v826_v63 }
  0x35   : > { %v580_v53 = vrot.slane %v2123_v1, 1  ;;  %v516_v48 = vsel %vm515_vm2, %v483_v39, %v499_v15  ;;  %v532_v46 = vsel %vm515_vm2, %v499_v15, %v483_v39  ;;  %v581_v9 = vrot.slane %v2136_v12, 1 }
  0x36   : > { %v517_v45 = vsel %vm515_vm2, %v484_v11, %v500_v43  ;;  %v533_v52 = vsel %vm515_vm2, %v500_v43, %v484_v11  ;;  %v1267_v0 = vadd.f32 %v1235_v41, %v1161_v26  ;;  %v1268_v2 = vadd.f32 %v1236_v31, %v1162_v44 }
  0x37   : > { %v548_v8 = vmul.f32 %v1910_v7, %v532_v46  ;;  %v2162_v63 = vmul.f32 %v1910_v7, %v533_v52  ;;  %v596_v10 = vrot.slane %v2133_v4, 1  ;;  %v597_v23 = vrot.slane %v2139_v22, 1 }
  0x38   : > { %v2168_v24 = vmul.f32 %v1934_v20, %v516_v48  ;;  %v1290_v32 = vpack.c.bf16 %v1268_v2, %v1267_v0  ;;  %v2174_v36 = vmul.f32 %v1934_v20, %v517_v45  ;;  %v844_v52 = vmul.f32 %v2014_v57, %v516_v48 }
  0x39   : > { %v2171_v33 = vmul.f32 %v1934_v20, %v548_v8  ;;  %v843_v39 = vmul.f32 %v2014_v57, %v548_v8  ;;  %v613_v41 = vsel %vm612_vm3, %v580_v53, %v596_v10  ;;  %v614_v11 = vsel %vm612_vm3, %v581_v9, %v597_v23 }
  0x3a   : > { %v629_v15 = vsel %vm612_vm3, %v596_v10, %v580_v53  ;;  %v630_v43 = vsel %vm612_vm3, %v597_v23, %v581_v9  ;;  %1766 = vmatmul.mubr.msk.bf16.vlgmr.msra.gmra.mrb[0].mxu1 %vm1305_vm5, %v1290_v32  ;;  %v779_v31 = vmul.f32 %v2012_v56, %v613_v41  ;;  %v2192_v46 = vmul.f32 %v2012_v56, %v614_v11 }
  0x3b   : > { %v646_v26 = vmul.f32 %v1922_v14, %v629_v15  ;;  %v2188_v44 = vmul.f32 %v1922_v14, %v630_v43  ;;  %v2196_v0 = vmul.f32 %v2014_v57, %v517_v45  ;;  %v879_v53 = vmul.f32 %v2016_v58, %v2123_v1 }
  0x3c   : > { %v880_v2 = vmul.f32 %v2016_v58, %v2133_v4  ;;  %v947_v9 = vmul.f32 %v2018_v59, %v613_v41  ;;  %v2206_v23 = vmul.f32 %v2018_v59, %v614_v11  ;;  %v1015_v15 = vmul.f32 %v2020_v60, %v2162_v63 }
  0x3d   : > { %v780_v8 = vmul.f32 %v2012_v56, %v646_v26  ;;  %v948_v10 = vmul.f32 %v2018_v59, %v646_v26  ;;  %v911_v32 = vadd.f32 %v879_v53, %v843_v39  ;;  %v1016_v43 = vmul.f32 %v2020_v60, %v517_v45 }
  0x3e   : > { %v912_v48 = vadd.f32 %v880_v2, %v844_v52  ;;  %v1049_v50 = vmul.f32 %v2022_v61, %v2136_v12  ;;  %v1050_v42 = vmul.f32 %v2022_v61, %v2139_v22  ;;  %v1113_v41 = vmul.f32 %v2024_v62, %v614_v11 }
  0x3f   : > { %v1114_v26 = vmul.f32 %v2024_v62, %v2188_v44  ;;  %v979_v39 = vadd.f32 %v947_v9, %v911_v32  ;;  %v1173_v52 = vrot.slane %v2143_v13, 7  ;;  %v1174_v2 = vrot.slane %v2145_v25, 7 }
  0x40   : > { %v980_v53 = vadd.f32 %v948_v10, %v912_v48  ;;  %v1079_v21 = vadd.f32 %v1049_v50, %v1015_v15  ;;  %v1080_v45 = vadd.f32 %v1050_v42, %v1016_v43  ;;  %v1179_v30 = vrot.slane %v2143_v13, 1  ;;  %v2234_v50 = vld [vmem:[%s1908_s8 + $0x28] sm:$0xff] }
  0x41   : > { %v1180_v6 = vrot.slane %v2145_v25, 1  ;;  %v1175_v11 = vsel %vm515_vm2, %v1173_v52, %v1174_v2  ;;  %v1176_v49 = vsel %vm515_vm2, %v1174_v2, %v1173_v52  ;;  %v1187_v9 = vmul.f32 %v2010_v55, %v2143_v13 }
  0x42   : > { %v1188_v10 = vmul.f32 %v2010_v55, %v2145_v25  ;;  %v1143_v42 = vadd.f32 %v1113_v41, %v1079_v21  ;;  %v1144_v32 = vadd.f32 %v1114_v26, %v1080_v45  ;;  %v1177_v48 = vmul.f32 %v1910_v7, %v1176_v49 }
  0x43   : > { %v1181_v15 = vsel %vm612_vm3, %v1179_v30, %v1180_v6  ;;  %v1182_v43 = vsel %vm612_vm3, %v1180_v6, %v1179_v30  ;;  %v1186_v52 = vmul.f32 %v1175_v11, %v1934_v20  ;;  %v485_v13 = vrot.slane %v2223_v37, 7 }
  0x44   : > { %v1191_v2 = vmul.f32 %v1181_v15, %v2012_v56  ;;  %v1184_v25 = vmul.f32 %v1922_v14, %v1182_v43  ;;  %v1185_v40 = vmul.f32 %v1177_v48, %v1934_v20  ;;  %v501_v21 = vrot.slane %v2234_v50, 7 }
  0x45   : > { %v582_v49 = vrot.slane %v2223_v37, 1  ;;  %v1190_v41 = vadd.f32 %v1188_v10, %v1186_v52  ;;  %v598_v26 = vrot.slane %v2234_v50, 1  ;;  %v715_v30 = vmul.f32 %v2010_v55, %v2123_v1 }
  0x46   : > { %v716_v6 = vmul.f32 %v2010_v55, %v2133_v4  ;;  %v1189_v45 = vadd.f32 %v1187_v9, %v1185_v40  ;;  %v1192_v11 = vmul.f32 %v1184_v25, %v2012_v56  ;;  %v2256_v15 = vsel %vm515_vm2, %v485_v13, %v501_v21 }
  0x47   : > { %v534_v48 = vsel %vm515_vm2, %v501_v21, %v485_v13  ;;  %v2265_v43 = vsel %vm612_vm3, %v582_v49, %v598_v26  ;;  %v631_v1 = vsel %vm612_vm3, %v598_v26, %v582_v49  ;;  %v745_v40 = vadd.f32 %v715_v30, %v2171_v33 }
  0x48   : > { %v2261_v10 = vmul.f32 %v1910_v7, %v534_v48  ;;  %v1193_v4 = vadd.f32 %v1191_v2, %v1189_v45  ;;  %v1194_v9 = vadd.f32 %v1192_v11, %v1190_v41  ;;  %v2271_v52 = vmul.f32 %v1922_v14, %v631_v1  ;;  %v2288_v45 = vld [vmem:[%s1908_s8 + $0xb0] sm:$0xff] }
  0x49   : > { %v746_v13 = vadd.f32 %v716_v6, %v2168_v24  ;;  %v809_v25 = vadd.f32 %v779_v31, %v745_v40  ;;  %v845_v21 = vmul.f32 %v2014_v57, %v2162_v63  ;;  %v881_v48 = vmul.f32 %v2016_v58, %v2136_v12 }
  0x4a   : > { %v882_v49 = vmul.f32 %v2016_v58, %v2139_v22  ;;  %v1217_v33 = vadd.f32 %v1193_v4, %v979_v39  ;;  %v1218_v2 = vadd.f32 %v1194_v9, %v980_v53  ;;  %v950_v41 = vmul.f32 %v2018_v59, %v2188_v44  ;;  %v2295_v53 = vld [vmem:[%s1908_s8 + $0xb8] sm:$0xff] }
  0x4b   : > { %v810_v26 = vadd.f32 %v780_v8, %v746_v13  ;;  %v913_v30 = vadd.f32 %v881_v48, %v845_v21  ;;  %v1017_v31 = vmul.f32 %v2020_v60, %v2261_v10  ;;  %v1018_v6 = vmul.f32 %v2020_v60, %v2256_v15 }
  0x4c   : > { %v914_v24 = vadd.f32 %v882_v49, %v2196_v0  ;;  %v1249_v11 = vadd.f32 %v1217_v33, %v1143_v42  ;;  %v1250_v1 = vadd.f32 %v1218_v2, %v1144_v32  ;;  %v1051_v39 = vmul.f32 %v2022_v61, %v2223_v37 }
  0x4d   : > { %v1052_v8 = vmul.f32 %v2022_v61, %v2234_v50  ;;  %v981_v0 = vadd.f32 %v2206_v23, %v913_v30  ;;  %v1115_v4 = vmul.f32 %v2024_v62, %v2265_v43  ;;  %v1116_v9 = vmul.f32 %v2024_v62, %v2271_v52 }
  0x4e   : > { %v982_v40 = vadd.f32 %v950_v41, %v914_v24  ;;  %v1281_v13 = vpack.c.bf16 %v1250_v1, %v1249_v11  ;;  %v1081_v42 = vadd.f32 %v1051_v39, %v1017_v31  ;;  %v494_v21 = vrot.slane %v2288_v45, 7 }
  0x4f   : > { %v1082_v32 = vadd.f32 %v1052_v8, %v1018_v6  ;;  %v1219_v48 = vadd.f32 %v981_v0, %v809_v25  ;;  %v510_v33 = vrot.slane %v2295_v53, 7  ;;  %v591_v2 = vrot.slane %v2288_v45, 1 }
  0x50   : > { %v1220_v49 = vadd.f32 %v982_v40, %v810_v26  ;;  %1749 = vmatprep.mubr.msk.bf16.mxu0 %vm1305_vm5, %v1281_v13  ;;  %v1145_v23 = vadd.f32 %v1115_v4, %v1081_v42  ;;  %v607_v30 = vrot.slane %v2295_v53, 1  ;;  %v699_v24 = vmul.f32 %v1934_v20, %v1965_v38 }
  0x51   : > { %v1146_v41 = vadd.f32 %v1116_v9, %v1082_v32  ;;  %v2311_v31 = vsel %vm515_vm2, %v494_v21, %v510_v33  ;;  %v543_v25 = vsel %vm515_vm2, %v510_v33, %v494_v21  ;;  %v733_v26 = vmul.f32 %v2010_v55, %v1928_v16 }
  0x52   : > { %v734_v6 = vmul.f32 %v2010_v55, %v1931_v17  ;;  %v1251_v11 = vadd.f32 %v1219_v48, %v1145_v23  ;;  %v2320_v39 = vmul.f32 %v1910_v7, %v543_v25  ;;  %v2324_v38 = vsel %vm612_vm3, %v591_v2, %v607_v30  ;;  %v2347_v48 = vld [vmem:[%s1908_s8 + $0xc8] sm:$0xff] }
  0x53   : > { %v1252_v1 = vadd.f32 %v1220_v49, %v1146_v41  ;;  %v640_v8 = vsel %vm612_vm3, %v607_v30, %v591_v2  ;;  %v763_v0 = vadd.f32 %v733_v26, %v699_v24  ;;  %v798_v17 = vmul.f32 %v2012_v56, %v1999_v51  ;;  %v2344_v51 = vld [vmem:[%s1908_s8 + $0xc0] sm:$0xff] }
  0x54   : > { %v764_v16 = vadd.f32 %v734_v6, %v2008_v54  ;;  %v2332_v4 = vmul.f32 %v1922_v14, %v640_v8  ;;  %v863_v9 = vmul.f32 %v2014_v57, %v2086_v18  ;;  %v864_v13 = vmul.f32 %v2014_v57, %v2081_v47 }
  0x55   : > { %v1282_v40 = vpack.c.bf16 %v1252_v1, %v1251_v11  ;;  %v827_v42 = vadd.f32 %v2035_v5, %v763_v0  ;;  %v899_v21 = vmul.f32 %v2016_v58, %v2060_v27  ;;  %v900_v54 = vmul.f32 %v2016_v58, %v2063_v28 }
  0x56   : > { %v828_v32 = vadd.f32 %v798_v17, %v764_v16  ;;  %v967_v49 = vmul.f32 %v2018_v59, %v2090_v19  ;;  %v968_v33 = vmul.f32 %v2018_v59, %v2105_v34  ;;  %v1035_v5 = vmul.f32 %v2020_v60, %v2320_v39 }
  0x57   : > { %1750 = vmatmul.mubr.msk.bf16.vlgmr.msra.gmra.mrb[0].mxu0 %vm1305_vm5, %v1282_v40  ;;  %v1036_v2 = vmul.f32 %v2020_v60, %v2311_v31  ;;  %v931_v23 = vadd.f32 %v899_v21, %v863_v9  ;;  %v932_v41 = vadd.f32 %v900_v54, %v864_v13  ;;  %v1069_v30 = vmul.f32 %v2022_v61, %v2288_v45 }
  0x58   : > { %v1070_v24 = vmul.f32 %v2022_v61, %v2295_v53  ;;  %v1133_v25 = vmul.f32 %v2024_v62, %v2324_v38  ;;  %v1134_v26 = vmul.f32 %v2024_v62, %v2332_v4  ;;  %v495_v6 = vrot.slane %v2344_v51, 7 }
  0x59   : > { %v511_v11 = vrot.slane %v2347_v48, 7  ;;  %v999_v1 = vadd.f32 %v967_v49, %v931_v23  ;;  %v1000_v8 = vadd.f32 %v968_v33, %v932_v41  ;;  %v1099_v0 = vadd.f32 %v1069_v30, %v1035_v5 }
  0x5a   : > { %v1100_v16 = vadd.f32 %v1070_v24, %v1036_v2  ;;  %v592_v9 = vrot.slane %v2344_v51, 1  ;;  %v608_v13 = vrot.slane %v2347_v48, 1  ;;  %v701_v2 = vmul.f32 %v1934_v20, %v2086_v18 }
  0x5b   : > { %v2370_v17 = vsel %vm515_vm2, %v495_v6, %v511_v11  ;;  %v544_v40 = vsel %vm515_vm2, %v511_v11, %v495_v6  ;;  %v1163_v21 = vadd.f32 %v1133_v25, %v1099_v0  ;;  %v1237_v29 = vadd.f32 %v999_v1, %v827_v42  ;;  %v2418_v0 = vld [vmem:[%s1908_s8 + $0x30] sm:$0xff] }
  0x5c   : > { %v1164_v54 = vadd.f32 %v1134_v26, %v1100_v16  ;;  %v1238_v35 = vadd.f32 %v1000_v8, %v828_v32  ;;  %v2377_v49 = vmul.f32 %v1910_v7, %v544_v40  ;;  %v2381_v33 = vsel %vm612_vm3, %v592_v9, %v608_v13  ;;  %v2421_v16 = vld [vmem:[%s1908_s8 + $0x38] sm:$0xff] }
  0x5d   : > { %v641_v5 = vsel %vm612_vm3, %v608_v13, %v592_v9  ;;  %v1269_v23 = vadd.f32 %v1237_v29, %v1163_v21  ;;  %v702_v42 = vmul.f32 %v1934_v20, %v2081_v47  ;;  %v735_v32 = vmul.f32 %v2010_v55, %v2060_v27 }
  0x5e   : > { %v1270_v41 = vadd.f32 %v1238_v35, %v1164_v54  ;;  %v2388_v30 = vmul.f32 %v1922_v14, %v641_v5  ;;  %v736_v24 = vmul.f32 %v2010_v55, %v2063_v28  ;;  %v799_v25 = vmul.f32 %v2012_v56, %v2090_v19 }
  0x5f   : > { %v800_v29 = vmul.f32 %v2012_v56, %v2105_v34  ;;  %v865_v18 = vmul.f32 %v2014_v57, %v2320_v39  ;;  %v866_v47 = vmul.f32 %v2014_v57, %v2311_v31  ;;  %v901_v27 = vmul.f32 %v2016_v58, %v2288_v45 }
  0x60   : > { %v1291_v35 = vpack.c.bf16 %v1270_v41, %v1269_v23  ;;  %v765_v26 = vadd.f32 %v735_v32, %v701_v2  ;;  %v766_v28 = vadd.f32 %v736_v24, %v702_v42  ;;  %v902_v6 = vmul.f32 %v2016_v58, %v2295_v53 }
  0x61   : > { %v969_v19 = vmul.f32 %v2018_v59, %v2324_v38  ;;  %v933_v34 = vadd.f32 %v901_v27, %v865_v18  ;;  %v970_v11 = vmul.f32 %v2018_v59, %v2332_v4  ;;  %v1037_v1 = vmul.f32 %v2020_v60, %v2377_v49 }
  0x62   : > { %1769 = vmatprep.mubr.msk.bf16.mxu1 %vm1305_vm5, %v1291_v35  ;;  %v1038_v8 = vmul.f32 %v2020_v60, %v2370_v17  ;;  %v829_v40 = vadd.f32 %v799_v25, %v765_v26  ;;  %v830_v9 = vadd.f32 %v800_v29, %v766_v28  ;;  %v934_v13 = vadd.f32 %v902_v6, %v866_v47 }
  0x63   : > { %v1071_v21 = vmul.f32 %v2022_v61, %v2344_v51  ;;  %v1001_v54 = vadd.f32 %v969_v19, %v933_v34  ;;  %v1072_v5 = vmul.f32 %v2022_v61, %v2347_v48  ;;  %v1135_v2 = vmul.f32 %v2024_v62, %v2381_v33 }
  0x64   : > { %v1136_v23 = vmul.f32 %v2024_v62, %v2388_v30  ;;  %v1002_v41 = vadd.f32 %v970_v11, %v934_v13  ;;  %v486_v32 = vrot.slane %v2418_v0, 7  ;;  %v502_v24 = vrot.slane %v2421_v16, 7 }
  0x65   : > { %v1101_v42 = vadd.f32 %v1071_v21, %v1037_v1  ;;  %v1102_v25 = vadd.f32 %v1072_v5, %v1038_v8  ;;  %v1239_v29 = vadd.f32 %v1001_v54, %v829_v40  ;;  %v583_v35 = vrot.slane %v2418_v0, 1 }
  0x66   : > { %v599_v18 = vrot.slane %v2421_v16, 1  ;;  %v1240_v27 = vadd.f32 %v1002_v41, %v830_v9  ;;  %v2437_v26 = vsel %vm515_vm2, %v486_v32, %v502_v24  ;;  %v535_v28 = vsel %vm515_vm2, %v502_v24, %v486_v32 }
  0x67   : > { %v1165_v47 = vadd.f32 %v1135_v2, %v1101_v42  ;;  %v1166_v6 = vadd.f32 %v1136_v23, %v1102_v25  ;;  %v2442_v19 = vmul.f32 %v1910_v7, %v535_v28  ;;  %v683_v40 = vmul.f32 %v1934_v20, %v2162_v63 }
  0x68   : > { %v2446_v34 = vsel %vm612_vm3, %v583_v35, %v599_v18  ;;  %v632_v11 = vsel %vm612_vm3, %v599_v18, %v583_v35  ;;  %v717_v9 = vmul.f32 %v2010_v55, %v2136_v12  ;;  %v718_v21 = vmul.f32 %v2010_v55, %v2139_v22  ;;  %v2478_v35 = vld [vmem:[%s1908_s8 + $0x40] sm:$0xff]  ;;  %v2481_v18 = vld [vmem:[%s1908_s8 + $0x48] sm:$0xff] }
  0x69   : > { %v1271_v1 = vadd.f32 %v1239_v29, %v1165_v47  ;;  %v2451_v8 = vmul.f32 %v1922_v14, %v632_v11  ;;  %v1272_v13 = vadd.f32 %v1240_v27, %v1166_v6  ;;  %v782_v54 = vmul.f32 %v2012_v56, %v2188_v44 }
  0x6a   : > { %v847_v5 = vmul.f32 %v2014_v57, %v2261_v10  ;;  %v747_v2 = vadd.f32 %v717_v9, %v683_v40  ;;  %v848_v23 = vmul.f32 %v2014_v57, %v2256_v15  ;;  %v883_v63 = vmul.f32 %v2016_v58, %v2223_v37 }
  0x6b   : > { %v884_v12 = vmul.f32 %v2016_v58, %v2234_v50  ;;  %v1292_v41 = vpack.c.bf16 %v1272_v13, %v1271_v1  ;;  %v748_v22 = vadd.f32 %v718_v21, %v2174_v36  ;;  %v951_v42 = vmul.f32 %v2018_v59, %v2265_v43 }
  0x6c   : > { %v952_v44 = vmul.f32 %v2018_v59, %v2271_v52  ;;  %v811_v32 = vadd.f32 %v2192_v46, %v747_v2  ;;  %v915_v24 = vadd.f32 %v883_v63, %v847_v5  ;;  %v1019_v29 = vmul.f32 %v2020_v60, %v2442_v19 }
  0x6d   : > { %v916_v25 = vadd.f32 %v884_v12, %v848_v23  ;;  %1770 = vmatmul.mubr.msk.bf16.gmra.mrb[4].mxu1 %vm1305_vm5, %v1292_v41  ;;  %v812_v36 = vadd.f32 %v782_v54, %v748_v22  ;;  %v1020_v47 = vmul.f32 %v2020_v60, %v2437_v26  ;;  %v1053_v27 = vmul.f32 %v2022_v61, %v2418_v0 }
  0x6e   : > { %v1054_v46 = vmul.f32 %v2022_v61, %v2421_v16  ;;  %v983_v28 = vadd.f32 %v951_v42, %v915_v24  ;;  %v1117_v11 = vmul.f32 %v2024_v62, %v2446_v34  ;;  %v1118_v1 = vmul.f32 %v2024_v62, %v2451_v8 }
  0x6f   : > { %v984_v6 = vadd.f32 %v952_v44, %v916_v25  ;;  %v1083_v40 = vadd.f32 %v1053_v27, %v1019_v29  ;;  %v487_v13 = vrot.slane %v2478_v35, 7  ;;  %v503_v21 = vrot.slane %v2481_v18, 7 }
  0x70   : > { %v1084_v9 = vadd.f32 %v1054_v46, %v1020_v47  ;;  %v1221_v54 = vadd.f32 %v983_v28, %v811_v32  ;;  %v584_v2 = vrot.slane %v2478_v35, 1  ;;  %v600_v23 = vrot.slane %v2481_v18, 1 }
  0x71   : > { %v1222_v5 = vadd.f32 %v984_v6, %v812_v36  ;;  %v1147_v63 = vadd.f32 %v1117_v11, %v1083_v40  ;;  %v2500_v41 = vsel %vm515_vm2, %v487_v13, %v503_v21  ;;  %v536_v22 = vsel %vm515_vm2, %v503_v21, %v487_v13 }
  0x72   : > { %v1148_v12 = vadd.f32 %v1118_v1, %v1084_v9  ;;  %v2505_v42 = vmul.f32 %v1910_v7, %v536_v22  ;;  %v2509_v44 = vsel %vm612_vm3, %v584_v2, %v600_v23  ;;  %v633_v32 = vsel %vm612_vm3, %v600_v23, %v584_v2 }
  0x73   : > { %v685_v24 = vmul.f32 %v1934_v20, %v2261_v10  ;;  %v1253_v25 = vadd.f32 %v1221_v54, %v1147_v63  ;;  %v2516_v36 = vmul.f32 %v1922_v14, %v633_v32  ;;  %v686_v47 = vmul.f32 %v1934_v20, %v2256_v15  ;;  %v2546_v54 = vld [vmem:[%s1908_s8 + $0xd0] sm:$0xff] }
  0x74   : > { %v1254_v29 = vadd.f32 %v1222_v5, %v1148_v12  ;;  %v719_v27 = vmul.f32 %v2010_v55, %v2223_v37  ;;  %v720_v46 = vmul.f32 %v2010_v55, %v2234_v50  ;;  %v783_v28 = vmul.f32 %v2012_v56, %v2265_v43  ;;  %v2549_v5 = vld [vmem:[%s1908_s8 + $0xd8] sm:$0xff] }
  0x75   : > { %v784_v10 = vmul.f32 %v2012_v56, %v2271_v52  ;;  %v849_v11 = vmul.f32 %v2014_v57, %v2442_v19  ;;  %v850_v15 = vmul.f32 %v2014_v57, %v2437_v26  ;;  %v885_v37 = vmul.f32 %v2016_v58, %v2418_v0 }
  0x76   : > { %v1283_v6 = vpack.c.bf16 %v1254_v29, %v1253_v25  ;;  %v749_v1 = vadd.f32 %v719_v27, %v685_v24  ;;  %v750_v50 = vadd.f32 %v720_v46, %v686_v47  ;;  %v886_v40 = vmul.f32 %v2016_v58, %v2421_v16 }
  0x77   : > { %v953_v43 = vmul.f32 %v2018_v59, %v2446_v34  ;;  %v917_v52 = vadd.f32 %v885_v37, %v849_v11  ;;  %v954_v9 = vmul.f32 %v2018_v59, %v2451_v8  ;;  %v1021_v13 = vmul.f32 %v2020_v60, %v2505_v42 }
  0x78   : > { %1753 = vmatprep.mubr.msk.bf16.mxu0 %vm1305_vm5, %v1283_v6  ;;  %v1022_v21 = vmul.f32 %v2020_v60, %v2500_v41  ;;  %v813_v2 = vadd.f32 %v783_v28, %v749_v1  ;;  %v814_v23 = vadd.f32 %v784_v10, %v750_v50  ;;  %v918_v63 = vadd.f32 %v886_v40, %v850_v15 }
  0x79   : > { %v1055_v12 = vmul.f32 %v2022_v61, %v2478_v35  ;;  %v985_v22 = vadd.f32 %v953_v43, %v917_v52  ;;  %v1056_v32 = vmul.f32 %v2022_v61, %v2481_v18  ;;  %v1119_v24 = vmul.f32 %v2024_v62, %v2509_v44 }
  0x7a   : > { %v1120_v25 = vmul.f32 %v2024_v62, %v2516_v36  ;;  %v986_v29 = vadd.f32 %v954_v9, %v918_v63  ;;  %v496_v27 = vrot.slane %v2546_v54, 7  ;;  %v512_v46 = vrot.slane %v2549_v5, 7 }
  0x7b   : > { %v1085_v47 = vadd.f32 %v1055_v12, %v1021_v13  ;;  %v1086_v28 = vadd.f32 %v1056_v32, %v1022_v21  ;;  %v1223_v10 = vadd.f32 %v985_v22, %v813_v2  ;;  %v593_v6 = vrot.slane %v2546_v54, 1 }
  0x7c   : > { %v609_v11 = vrot.slane %v2549_v5, 1  ;;  %v1224_v37 = vadd.f32 %v986_v29, %v814_v23  ;;  %v2565_v1 = vsel %vm515_vm2, %v496_v27, %v512_v46  ;;  %v545_v50 = vsel %vm515_vm2, %v512_v46, %v496_v27 }
  0x7d   : > { %v1149_v15 = vadd.f32 %v1119_v24, %v1085_v47  ;;  %v1150_v40 = vadd.f32 %v1120_v25, %v1086_v28  ;;  %v2570_v43 = vmul.f32 %v1910_v7, %v545_v50  ;;  %v703_v2 = vmul.f32 %v1934_v20, %v2320_v39  ;;  %v2608_v28 = vld [vmem:[%s1908_s8 + $0xe0] sm:$0xff] }
  0x7e   : > { %v2574_v52 = vsel %vm612_vm3, %v593_v6, %v609_v11  ;;  %v642_v9 = vsel %vm612_vm3, %v609_v11, %v593_v6  ;;  %v704_v23 = vmul.f32 %v1934_v20, %v2311_v31  ;;  %v737_v12 = vmul.f32 %v2010_v55, %v2288_v45 }
  0x7f   : > { %v1255_v13 = vadd.f32 %v1223_v10, %v1149_v15  ;;  %v2579_v21 = vmul.f32 %v1922_v14, %v642_v9  ;;  %v1256_v63 = vadd.f32 %v1224_v37, %v1150_v40  ;;  %v738_v22 = vmul.f32 %v2010_v55, %v2295_v53  ;;  %v2611_v10 = vld [vmem:[%s1908_s8 + $0xe8] sm:$0xff] }
  0x80   : > { %v801_v32 = vmul.f32 %v2012_v56, %v2324_v38  ;;  %v802_v24 = vmul.f32 %v2012_v56, %v2332_v4  ;;  %v867_v39 = vmul.f32 %v2014_v57, %v2377_v49  ;;  %v868_v31 = vmul.f32 %v2014_v57, %v2370_v17 }
  0x81   : > { %v903_v25 = vmul.f32 %v2016_v58, %v2344_v51  ;;  %v1284_v45 = vpack.c.bf16 %v1256_v63, %v1255_v13  ;;  %v767_v29 = vadd.f32 %v737_v12, %v703_v2  ;;  %v768_v47 = vadd.f32 %v738_v22, %v704_v23 }
  0x82   : > { %v904_v53 = vmul.f32 %v2016_v58, %v2347_v48  ;;  %v971_v38 = vmul.f32 %v2018_v59, %v2381_v33  ;;  %v972_v4 = vmul.f32 %v2018_v59, %v2388_v30  ;;  %v1039_v46 = vmul.f32 %v2020_v60, %v2570_v43 }
  0x83   : > { %v935_v27 = vadd.f32 %v903_v25, %v867_v39  ;;  %1754 = vmatmul.mubr.msk.bf16.gmra.mrb[4].mxu0 %vm1305_vm5, %v1284_v45  ;;  %v831_v6 = vadd.f32 %v801_v32, %v767_v29  ;;  %v832_v11 = vadd.f32 %v802_v24, %v768_v47  ;;  %v1040_v37 = vmul.f32 %v2020_v60, %v2565_v1 }
  0x84   : > { %v936_v15 = vadd.f32 %v904_v53, %v868_v31  ;;  %v1073_v40 = vmul.f32 %v2022_v61, %v2546_v54  ;;  %v1074_v9 = vmul.f32 %v2022_v61, %v2549_v5  ;;  %v1137_v13 = vmul.f32 %v2024_v62, %v2574_v52 }
  0x85   : > { %v1003_v50 = vadd.f32 %v971_v38, %v935_v27  ;;  %v1138_v23 = vmul.f32 %v2024_v62, %v2579_v21  ;;  %v497_v63 = vrot.slane %v2608_v28, 7  ;;  %v513_v12 = vrot.slane %v2611_v10, 7 }
  0x86   : > { %v1004_v2 = vadd.f32 %v972_v4, %v936_v15  ;;  %v1103_v22 = vadd.f32 %v1073_v40, %v1039_v46  ;;  %v1104_v32 = vadd.f32 %v1074_v9, %v1040_v37  ;;  %v594_v39 = vrot.slane %v2608_v28, 1 }
  0x87   : > { %v1241_v24 = vadd.f32 %v1003_v50, %v831_v6  ;;  %v2629_v25 = vsel %vm515_vm2, %v497_v63, %v513_v12  ;;  %v546_v45 = vsel %vm515_vm2, %v513_v12, %v497_v63  ;;  %v610_v29 = vrot.slane %v2611_v10, 1 }
  0x88   : > { %v1242_v31 = vadd.f32 %v1004_v2, %v832_v11  ;;  %v1167_v47 = vadd.f32 %v1137_v13, %v1103_v22  ;;  %v1168_v53 = vadd.f32 %v1138_v23, %v1104_v32  ;;  %v2635_v27 = vmul.f32 %v1910_v7, %v546_v45  ;;  %v2671_v22 = vld [vmem:[%s1908_s8 + $0x50] sm:$0xff]  ;;  %v2674_v32 = vld [vmem:[%s1908_s8 + $0x58] sm:$0xff] }
  0x89   : > { %v705_v38 = vmul.f32 %v1934_v20, %v2377_v49  ;;  %v2641_v4 = vsel %vm612_vm3, %v594_v39, %v610_v29  ;;  %v643_v46 = vsel %vm612_vm3, %v610_v29, %v594_v39  ;;  %v706_v6 = vmul.f32 %v1934_v20, %v2370_v17 }
  0x8a   : > { %v739_v11 = vmul.f32 %v2010_v55, %v2344_v51  ;;  %v1273_v15 = vadd.f32 %v1241_v24, %v1167_v47  ;;  %v1274_v37 = vadd.f32 %v1242_v31, %v1168_v53  ;;  %v2650_v50 = vmul.f32 %v1922_v14, %v643_v46 }
  0x8b   : > { %v740_v49 = vmul.f32 %v2010_v55, %v2347_v48  ;;  %v803_v9 = vmul.f32 %v2012_v56, %v2381_v33  ;;  %v804_v17 = vmul.f32 %v2012_v56, %v2388_v30  ;;  %v869_v51 = vmul.f32 %v2014_v57, %v2570_v43 }
  0x8c   : > { %v769_v40 = vadd.f32 %v739_v11, %v705_v38  ;;  %v1293_v13 = vpack.c.bf16 %v1274_v37, %v1273_v15  ;;  %v870_v23 = vmul.f32 %v2014_v57, %v2565_v1  ;;  %v905_v63 = vmul.f32 %v2016_v58, %v2546_v54 }
  0x8d   : > { %v770_v2 = vadd.f32 %v740_v49, %v706_v6  ;;  %v906_v48 = vmul.f32 %v2016_v58, %v2549_v5  ;;  %v973_v33 = vmul.f32 %v2018_v59, %v2574_v52  ;;  %v974_v30 = vmul.f32 %v2018_v59, %v2579_v21 }
  0x8e   : > { %v833_v12 = vadd.f32 %v803_v9, %v769_v40  ;;  %1773 = vmatprep.mubr.msk.bf16.mxu1 %vm1305_vm5, %v1293_v13  ;;  %v937_v39 = vadd.f32 %v905_v63, %v869_v51  ;;  %v1041_v31 = vmul.f32 %v2020_v60, %v2635_v27  ;;  %v1042_v45 = vmul.f32 %v2020_v60, %v2629_v25 }
  0x8f   : > { %v834_v24 = vadd.f32 %v804_v17, %v770_v2  ;;  %v938_v29 = vadd.f32 %v906_v48, %v870_v23  ;;  %v1075_v47 = vmul.f32 %v2022_v61, %v2608_v28  ;;  %v1076_v53 = vmul.f32 %v2022_v61, %v2611_v10 }
  0x90   : > { %v1139_v38 = vmul.f32 %v2024_v62, %v2641_v4  ;;  %v1005_v46 = vadd.f32 %v973_v33, %v937_v39  ;;  %v1140_v6 = vmul.f32 %v2024_v62, %v2650_v50  ;;  %v488_v11 = vrot.slane %v2671_v22, 7 }
  0x91   : > { %v504_v15 = vrot.slane %v2674_v32, 7  ;;  %v1006_v37 = vadd.f32 %v974_v30, %v938_v29  ;;  %v1105_v49 = vadd.f32 %v1075_v47, %v1041_v31  ;;  %v1106_v40 = vadd.f32 %v1076_v53, %v1042_v45 }
  0x92   : > { %v585_v9 = vrot.slane %v2671_v22, 1  ;;  %v1243_v17 = vadd.f32 %v1005_v46, %v833_v12  ;;  %v601_v2 = vrot.slane %v2674_v32, 1  ;;  %v687_v39 = vmul.f32 %v1934_v20, %v2442_v19 }
  0x93   : > { %v2694_v51 = vsel %vm515_vm2, %v488_v11, %v504_v15  ;;  %v537_v13 = vsel %vm515_vm2, %v504_v15, %v488_v11  ;;  %v1169_v23 = vadd.f32 %v1139_v38, %v1105_v49  ;;  %v1170_v63 = vadd.f32 %v1140_v6, %v1106_v40 }
  0x94   : > { %v1244_v48 = vadd.f32 %v1006_v37, %v834_v24  ;;  %v2700_v33 = vmul.f32 %v1910_v7, %v537_v13  ;;  %v2704_v30 = vsel %vm612_vm3, %v585_v9, %v601_v2  ;;  %v634_v12 = vsel %vm612_vm3, %v601_v2, %v585_v9  ;;  %v2736_v37 = vld [vmem:[%s1908_s8 + $0x60] sm:$0xff]  ;;  %v2744_v13 = vld [vmem:[%s1908_s8 + $0x68] sm:$0xff] }
  0x95   : > { %v688_v31 = vmul.f32 %v1934_v20, %v2437_v26  ;;  %v1275_v45 = vadd.f32 %v1243_v17, %v1169_v23  ;;  %v2713_v24 = vmul.f32 %v1922_v14, %v634_v12  ;;  %v721_v47 = vmul.f32 %v2010_v55, %v2418_v0 }
  0x96   : > { %v1276_v29 = vadd.f32 %v1244_v48, %v1170_v63  ;;  %v722_v53 = vmul.f32 %v2010_v55, %v2421_v16  ;;  %v785_v38 = vmul.f32 %v2012_v56, %v2446_v34  ;;  %v786_v19 = vmul.f32 %v2012_v56, %v2451_v8 }
  0x97   : > { %v851_v26 = vmul.f32 %v2014_v57, %v2505_v42  ;;  %v751_v6 = vadd.f32 %v721_v47, %v687_v39  ;;  %v852_v11 = vmul.f32 %v2014_v57, %v2500_v41  ;;  %v887_v0 = vmul.f32 %v2016_v58, %v2478_v35 }
  0x98   : > { %v1294_v46 = vpack.c.bf16 %v1276_v29, %v1275_v45  ;;  %v752_v15 = vadd.f32 %v722_v53, %v688_v31  ;;  %v888_v16 = vmul.f32 %v2016_v58, %v2481_v18  ;;  %v955_v34 = vmul.f32 %v2018_v59, %v2509_v44 }
  0x99   : > { %v956_v8 = vmul.f32 %v2018_v59, %v2516_v36  ;;  %v815_v49 = vadd.f32 %v785_v38, %v751_v6  ;;  %v919_v40 = vadd.f32 %v887_v0, %v851_v26  ;;  %v1023_v9 = vmul.f32 %v2020_v60, %v2700_v33 }
  0x9a   : > { %1774 = vmatmul.mubr.msk.bf16.gmra.mrb[8].mxu1 %vm1305_vm5, %v1294_v46  ;;  %v1024_v17 = vmul.f32 %v2020_v60, %v2694_v51  ;;  %v816_v2 = vadd.f32 %v786_v19, %v752_v15  ;;  %v920_v23 = vadd.f32 %v888_v16, %v852_v11  ;;  %v1057_v63 = vmul.f32 %v2022_v61, %v2671_v22 }
  0x9b   : > { %v1058_v48 = vmul.f32 %v2022_v61, %v2674_v32  ;;  %v987_v12 = vadd.f32 %v955_v34, %v919_v40  ;;  %v1121_v39 = vmul.f32 %v2024_v62, %v2704_v30  ;;  %v1122_v31 = vmul.f32 %v2024_v62, %v2713_v24 }
  0x9c   : > { %v489_v45 = vrot.slane %v2736_v37, 7  ;;  %v988_v29 = vadd.f32 %v956_v8, %v920_v23  ;;  %v1087_v47 = vadd.f32 %v1057_v63, %v1023_v9  ;;  %v505_v38 = vrot.slane %v2744_v13, 7 }
  0x9d   : > { %v1088_v53 = vadd.f32 %v1058_v48, %v1024_v17  ;;  %v1225_v19 = vadd.f32 %v987_v12, %v815_v49  ;;  %v586_v26 = vrot.slane %v2736_v37, 1  ;;  %v602_v46 = vrot.slane %v2744_v13, 1 }
  0x9e   : > { %v689_v6 = vmul.f32 %v1934_v20, %v2505_v42  ;;  %v1151_v11 = vadd.f32 %v1121_v39, %v1087_v47  ;;  %v1226_v15 = vadd.f32 %v988_v29, %v816_v2  ;;  %v2762_v16 = vsel %vm515_vm2, %v489_v45, %v505_v38 }
  0x9f   : > { %v1152_v0 = vadd.f32 %v1122_v31, %v1088_v53  ;;  %v538_v34 = vsel %vm515_vm2, %v505_v38, %v489_v45  ;;  %v2768_v8 = vsel %vm612_vm3, %v586_v26, %v602_v46  ;;  %v635_v49 = vsel %vm612_vm3, %v602_v46, %v586_v26  ;;  %v2809_v26 = vld [vmem:[%s1908_s8 + $0xf8] sm:$0xff] }
  0xa0   : > { %v690_v42 = vmul.f32 %v1934_v20, %v2500_v41  ;;  %v1257_v40 = vadd.f32 %v1225_v19, %v1151_v11  ;;  %v2775_v17 = vmul.f32 %v1910_v7, %v538_v34  ;;  %v2778_v2 = vmul.f32 %v1922_v14, %v635_v49  ;;  %v2806_v19 = vld [vmem:[%s1908_s8 + $0xf0] sm:$0xff] }
  0xa1   : > { %v1258_v9 = vadd.f32 %v1226_v15, %v1152_v0  ;;  %v723_v23 = vmul.f32 %v2010_v55, %v2478_v35  ;;  %v724_v63 = vmul.f32 %v2010_v55, %v2481_v18  ;;  %v787_v48 = vmul.f32 %v2012_v56, %v2509_v44 }
  0xa2   : > { %v788_v41 = vmul.f32 %v2012_v56, %v2516_v36  ;;  %v853_v39 = vmul.f32 %v2014_v57, %v2700_v33  ;;  %v854_v31 = vmul.f32 %v2014_v57, %v2694_v51  ;;  %v889_v35 = vmul.f32 %v2016_v58, %v2671_v22 }
  0xa3   : > { %v1285_v12 = vpack.c.bf16 %v1258_v9, %v1257_v40  ;;  %v753_v45 = vadd.f32 %v723_v23, %v689_v6  ;;  %v754_v18 = vadd.f32 %v724_v63, %v690_v42  ;;  %v890_v29 = vmul.f32 %v2016_v58, %v2674_v32 }
  0xa4   : > { %v957_v44 = vmul.f32 %v2018_v59, %v2704_v30  ;;  %v921_v36 = vadd.f32 %v889_v35, %v853_v39  ;;  %v958_v47 = vmul.f32 %v2018_v59, %v2713_v24  ;;  %v1025_v53 = vmul.f32 %v2020_v60, %v2775_v17 }
  0xa5   : > { %1757 = vmatprep.mubr.msk.bf16.mxu0 %vm1305_vm5, %v1285_v12  ;;  %v1026_v38 = vmul.f32 %v2020_v60, %v2762_v16  ;;  %v817_v46 = vadd.f32 %v787_v48, %v753_v45  ;;  %v818_v6 = vadd.f32 %v788_v41, %v754_v18  ;;  %v922_v11 = vadd.f32 %v890_v29, %v854_v31 }
  0xa6   : > { %v1059_v0 = vmul.f32 %v2022_v61, %v2736_v37  ;;  %v989_v15 = vadd.f32 %v957_v44, %v921_v36  ;;  %v1060_v34 = vmul.f32 %v2022_v61, %v2744_v13  ;;  %v1123_v49 = vmul.f32 %v2024_v62, %v2768_v8 }
  0xa7   : > { %v1124_v42 = vmul.f32 %v2024_v62, %v2778_v2  ;;  %v990_v40 = vadd.f32 %v958_v47, %v922_v11  ;;  %v498_v23 = vrot.slane %v2806_v19, 7  ;;  %v514_v63 = vrot.slane %v2809_v26, 7 }
  0xa8   : > { %v1089_v9 = vadd.f32 %v1059_v0, %v1025_v53  ;;  %v1090_v48 = vadd.f32 %v1060_v34, %v1026_v38  ;;  %v1227_v41 = vadd.f32 %v989_v15, %v817_v46  ;;  %v595_v12 = vrot.slane %v2806_v19, 1 }
  0xa9   : > { %v611_v39 = vrot.slane %v2809_v26, 1  ;;  %v1228_v35 = vadd.f32 %v990_v40, %v818_v6  ;;  %v531_v45 = vsel %vm515_vm2, %v498_v23, %v514_v63  ;;  %v547_v18 = vsel %vm515_vm2, %v514_v63, %v498_v23 }
  0xaa   : > { %v1153_v31 = vadd.f32 %v1123_v49, %v1089_v9  ;;  %v1154_v29 = vadd.f32 %v1124_v42, %v1090_v48  ;;  %v578_v44 = vmul.f32 %v1910_v7, %v547_v18  ;;  %v707_v46 = vmul.f32 %v1934_v20, %v2570_v43  ;;  %v479_v48 = vld [vmem:[%s404_s19] sm:$0xff] }
  0xab   : > { %v628_v36 = vsel %vm612_vm3, %v595_v12, %v611_v39  ;;  %v644_v47 = vsel %vm612_vm3, %v611_v39, %v595_v12  ;;  %v708_v6 = vmul.f32 %v1934_v20, %v2565_v1  ;;  %v741_v0 = vmul.f32 %v2010_v55, %v2546_v54 }
  0xac   : > { %v1259_v53 = vadd.f32 %v1227_v41, %v1153_v31  ;;  %v676_v38 = vmul.f32 %v1922_v14, %v644_v47  ;;  %v1260_v11 = vadd.f32 %v1228_v35, %v1154_v29  ;;  %v742_v15 = vmul.f32 %v2010_v55, %v2549_v5  ;;  %v480_v41 = vld [vmem:[%s404_s19 + $0x8] sm:$0xff] }
  0xad   : > { %v805_v34 = vmul.f32 %v2012_v56, %v2574_v52  ;;  %v806_v43 = vmul.f32 %v2012_v56, %v2579_v21  ;;  %v871_v1 = vmul.f32 %v2014_v57, %v2635_v27  ;;  %v872_v49 = vmul.f32 %v2014_v57, %v2629_v25 }
  0xae   : > { %v907_v54 = vmul.f32 %v2016_v58, %v2608_v28  ;;  %v1286_v5 = vpack.c.bf16 %v1260_v11, %v1259_v53  ;;  %v771_v42 = vadd.f32 %v741_v0, %v707_v46  ;;  %v772_v40 = vadd.f32 %v742_v15, %v708_v6 }
  0xaf   : > { %v908_v52 = vmul.f32 %v2016_v58, %v2611_v10  ;;  %v975_v23 = vmul.f32 %v2018_v59, %v2641_v4  ;;  %v976_v21 = vmul.f32 %v2018_v59, %v2650_v50  ;;  %v1043_v63 = vmul.f32 %v2020_v60, %v578_v44 }
  0xb0   : > { %v939_v9 = vadd.f32 %v907_v54, %v871_v1  ;;  %1758 = vmatmul.mubr.msk.bf16.gmra.mrb[8].mxu0 %vm1305_vm5, %v1286_v5  ;;  %v835_v12 = vadd.f32 %v805_v34, %v771_v42  ;;  %v836_v39 = vadd.f32 %v806_v43, %v772_v40  ;;  %v1044_v35 = vmul.f32 %v2020_v60, %v531_v45 }
  0xb1   : > { %v940_v31 = vadd.f32 %v908_v52, %v872_v49  ;;  %v1077_v29 = vmul.f32 %v2022_v61, %v2806_v19  ;;  %v1078_v47 = vmul.f32 %v2022_v61, %v2809_v26  ;;  %v1141_v53 = vmul.f32 %v2024_v62, %v628_v36 }
  0xb2   : > { %v1007_v18 = vadd.f32 %v975_v23, %v939_v9  ;;  %v1142_v6 = vmul.f32 %v2024_v62, %v676_v38  ;;  %v481_v11 = vmul.f32 0.0, %v479_v48  ;;  %v482_v0 = vmul.f32 0.0, %v480_v41 }
  0xb3   : > { %v1008_v46 = vadd.f32 %v976_v21, %v940_v31  ;;  %v1107_v15 = vadd.f32 %v1077_v29, %v1043_v63  ;;  %v1108_v34 = vadd.f32 %v1078_v47, %v1044_v35  ;;  %v709_v1 = vmul.f32 %v1934_v20, %v2635_v27 }
  0xb4   : > { %v1245_v43 = vadd.f32 %v1007_v18, %v835_v12  ;;  %v710_v54 = vmul.f32 %v1934_v20, %v2629_v25  ;;  %v743_v5 = vmul.f32 %v2010_v55, %v2608_v28  ;;  %v744_v42 = vmul.f32 %v2010_v55, %v2611_v10 }
  0xb5   : > { %v1246_v49 = vadd.f32 %v1008_v46, %v836_v39  ;;  %v1171_v40 = vadd.f32 %v1141_v53, %v1107_v15  ;;  %v1172_v52 = vadd.f32 %v1142_v6, %v1108_v34  ;;  %v807_v9 = vmul.f32 %v2012_v56, %v2641_v4 }
  0xb6   : > { %v808_v23 = vmul.f32 %v2012_v56, %v2650_v50  ;;  %v773_v21 = vadd.f32 %v743_v5, %v709_v1  ;;  %v774_v27 = vadd.f32 %v744_v42, %v710_v54  ;;  %v873_v63 = vmul.f32 %v2014_v57, %v578_v44 }
  0xb7   : > { %v874_v25 = vmul.f32 %v2014_v57, %v531_v45  ;;  %v1277_v48 = vadd.f32 %v1245_v43, %v1171_v40  ;;  %v1278_v41 = vadd.f32 %v1246_v49, %v1172_v52  ;;  %v909_v28 = vmul.f32 %v2016_v58, %v2806_v19 }
  0xb8   : > { %v910_v10 = vmul.f32 %v2016_v58, %v2809_v26  ;;  %v837_v12 = vadd.f32 %v807_v9, %v773_v21  ;;  %v838_v39 = vadd.f32 %v808_v23, %v774_v27  ;;  %v977_v4 = vmul.f32 %v2018_v59, %v628_v36 }
  0xb9   : > { %v978_v50 = vmul.f32 %v2018_v59, %v676_v38  ;;  %v1295_v31 = vpack.c.bf16 %v1278_v41, %v1277_v48  ;;  %v941_v35 = vadd.f32 %v909_v28, %v873_v63  ;;  %v1195_v44 = vrot.slane %v481_v11, 7 }
  0xba   : > { %v942_v18 = vadd.f32 %v910_v10, %v874_v25  ;;  %v1196_v29 = vrot.slane %v482_v0, 7  ;;  %v1201_v45 = vrot.slane %v481_v11, 1  ;;  %v1202_v47 = vrot.slane %v482_v0, 1 }
  0xbb   : > { %v1209_v53 = vmul.f32 %v2022_v61, %v481_v11  ;;  %1777 = vmatprep.mubr.msk.bf16.mxu1 %vm1305_vm5, %v1295_v31  ;;  %v1009_v19 = vadd.f32 %v977_v4, %v941_v35  ;;  %v1210_v26 = vmul.f32 %v2022_v61, %v482_v0  ;;  %v691_v36 = vmul.f32 %v1934_v20, %v2700_v33 }
  0xbc   : > { %v1010_v46 = vadd.f32 %v978_v50, %v942_v18  ;;  %v1197_v38 = vsel %vm515_vm2, %v1195_v44, %v1196_v29  ;;  %v1198_v6 = vsel %vm515_vm2, %v1196_v29, %v1195_v44  ;;  %v1203_v15 = vsel %vm612_vm3, %v1201_v45, %v1202_v47  ;;  %v3122_v50 = vld [vmem:[#allocation2_spill] sm:$0xff]  ;;  %v1810_v18 = vld [vmem:[%s1908_s8 + $0x70] sm:$0xff]  ;;  %v1811_v29 = vld [vmem:[%s1908_s8 + $0x78] sm:$0xff] }
  0xbd   : > { %v1204_v11 = vsel %vm612_vm3, %v1202_v47, %v1201_v45  ;;  %v1199_v34 = vmul.f32 %v1910_v7, %v1198_v6  ;;  %v1208_v0 = vmul.f32 %v1197_v38, %v2020_v60  ;;  %v1213_v33 = vmul.f32 %v1203_v15, %v2024_v62  ;;  %v3123_v47 = vld [vmem:[#allocation6_spill] sm:$0xff] }
  0xbe   : > { %v1206_v43 = vmul.f32 %v1922_v14, %v1204_v11  ;;  %v1247_v1 = vadd.f32 %v1009_v19, %v837_v12  ;;  %v1248_v49 = vadd.f32 %v1010_v46, %v838_v39  ;;  %v692_v54 = vmul.f32 %v1934_v20, %v2694_v51  ;;  %v3121_v39 = vld [vmem:[#allocation4_spill] sm:$0xff] }
  0xbf   : > { %v725_v5 = vmul.f32 %v2010_v55, %v2671_v22  ;;  %v1207_v42 = vmul.f32 %v1199_v34, %v2020_v60  ;;  %v1212_v3 = vadd.f32 %v1210_v26, %v1208_v0  ;;  %v726_v7 = vmul.f32 %v2010_v55, %v2674_v32  ;;  %v3124_v26 = vld [vmem:[#allocation8_spill] sm:$0xff] }
  0xc0   : > { %v1214_v40 = vmul.f32 %v1206_v43, %v2024_v62  ;;  %v789_v52 = vmul.f32 %v2012_v56, %v2704_v30  ;;  %v790_v9 = vmul.f32 %v2012_v56, %v2713_v24  ;;  %v855_v51 = vmul.f32 %v2014_v57, %v2775_v17 }
  0xc1   : > { %v755_v14 = vadd.f32 %v725_v5, %v691_v36  ;;  %v1211_v23 = vadd.f32 %v1209_v53, %v1207_v42  ;;  %v756_v21 = vadd.f32 %v726_v7, %v692_v54  ;;  %v856_v27 = vmul.f32 %v2014_v57, %v2762_v16 }
  0xc2   : > { %v1216_v22 = vadd.f32 %v1214_v40, %v1212_v3  ;;  %v891_v32 = vmul.f32 %v2016_v58, %v2736_v37  ;;  %v892_v30 = vmul.f32 %v2016_v58, %v2744_v13  ;;  %v959_v24 = vmul.f32 %v2018_v59, %v2768_v8 }
  0xc3   : > { %v819_v63 = vadd.f32 %v789_v52, %v755_v14  ;;  %v1215_v25 = vadd.f32 %v1213_v33, %v1211_v23  ;;  %v820_v41 = vadd.f32 %v790_v9, %v756_v21  ;;  %v960_v28 = vmul.f32 %v2018_v59, %v2778_v2  ;;  %v3126_v9 = vld [vmem:[#allocation10_spill] sm:$0xff] }
  0xc4   : > { %v1280_v48 = vadd.f32 %v1248_v49, %v1216_v22  ;;  %v923_v10 = vadd.f32 %v891_v32, %v855_v51  ;;  %v924_v12 = vadd.f32 %v892_v30, %v856_v27  ;;  %v1027_v4 = vmul.f32 %v2020_v60, %v3121_v39  ;;  %v1812_v22 = vld [vmem:[%s1908_s8 + $0x80] sm:$0xff]  ;;  %v3128_v27 = vld [vmem:[#allocation11_spill] sm:$0xff] }
  0xc5   : > { %v1028_v31 = vmul.f32 %v2020_v60, %v3122_v50  ;;  %v1279_v35 = vadd.f32 %v1247_v1, %v1215_v25  ;;  %v1061_v44 = vmul.f32 %v1810_v18, %v2022_v61  ;;  %v1062_v45 = vmul.f32 %v1811_v29, %v2022_v61  ;;  %v3129_v32 = vld [vmem:[#allocation7_spill] sm:$0xff] }
  0xc6   : > { %v1125_v53 = vmul.f32 %v2024_v62, %v3123_v47  ;;  %v991_v19 = vadd.f32 %v959_v24, %v923_v10  ;;  %v992_v46 = vadd.f32 %v960_v28, %v924_v12  ;;  %v1126_v36 = vmul.f32 %v2024_v62, %v3124_v26  ;;  %v3130_v24 = vld [vmem:[#allocation9_spill] sm:$0xff] }
  0xc7   : > { %v693_v38 = vmul.f32 %v1934_v20, %v2775_v17  ;;  %v1296_v6 = vpack.c.bf16 %v1280_v48, %v1279_v35  ;;  %v1091_v15 = vadd.f32 %v1061_v44, %v1027_v4  ;;  %v1092_v11 = vadd.f32 %v1062_v45, %v1028_v31 }
  0xc8   : > { %v694_v34 = vmul.f32 %v1934_v20, %v2762_v16  ;;  %v1229_v43 = vadd.f32 %v991_v19, %v819_v63  ;;  %v1230_v0 = vadd.f32 %v992_v46, %v820_v41  ;;  %v727_v33 = vmul.f32 %v2010_v55, %v2736_v37  ;;  %v1813_v63 = vld [vmem:[%s1908_s8 + $0x88] sm:$0xff] }
  0xc9   : > { %v728_v1 = vmul.f32 %v2010_v55, %v2744_v13  ;;  %1778 = vmatmul.mubr.msk.bf16.gmra.mrb[12].mxu1 %vm1305_vm5, %v1296_v6  ;;  %v1155_v49 = vadd.f32 %v1125_v53, %v1091_v15  ;;  %v1156_v54 = vadd.f32 %v1126_v36, %v1092_v11  ;;  %v791_v17 = vmul.f32 %v2012_v56, %v2768_v8 }
  0xca   : > { %v792_v5 = vmul.f32 %v2012_v56, %v2778_v2  ;;  %v757_v20 = vadd.f32 %v727_v33, %v693_v38  ;;  %v857_v42 = vmul.f32 %v2014_v57, %v3121_v39  ;;  %v893_v37 = vmul.f32 %v1810_v18, %v2016_v58  ;;  %v3125_v56 = vld [vmem:[#allocation5_spill] sm:$0xff]  ;;  %v3127_v57 = vld [vmem:[#allocation3_spill] sm:$0xff] }
  0xcb   : > { %v758_v16 = vadd.f32 %v728_v1, %v694_v34  ;;  %v1261_v55 = vadd.f32 %v1229_v43, %v1155_v49  ;;  %v1262_v13 = vadd.f32 %v1230_v0, %v1156_v54  ;;  %v894_v3 = vmul.f32 %v1811_v29, %v2016_v58 }
  0xcc   : > { %v962_v40 = vmul.f32 %v2018_v59, %v3124_v26  ;;  %v821_v8 = vadd.f32 %v791_v17, %v757_v20  ;;  %v925_v14 = vadd.f32 %v893_v37, %v857_v42  ;;  %v1029_v2 = vmul.f32 %v2020_v60, %v3125_v56 }
  0xcd   : > { %v822_v7 = vadd.f32 %v792_v5, %v758_v16  ;;  %v1287_v52 = vpack.c.bf16 %v1262_v13, %v1261_v55  ;;  %v926_v51 = vadd.f32 %v894_v3, %v3126_v9  ;;  %v1030_v23 = vmul.f32 %v2020_v60, %v3127_v57 }
  0xce   : > { %v1063_v21 = vmul.f32 %v1812_v22, %v2022_v61  ;;  %v993_v58 = vadd.f32 %v3128_v27, %v925_v14  ;;  %v1064_v59 = vmul.f32 %v1813_v63, %v2022_v61  ;;  %v1127_v30 = vmul.f32 %v2024_v62, %v3129_v32  ;;  %v2981_v61 = vld [vmem:[%s3099_s5] ss:$0 sm:$0xff] }
  0xcf   : > { %v1128_v25 = vmul.f32 %v2024_v62, %v3130_v24  ;;  %1761 = vmatprep.mubr.msk.bf16.mxu0 %vm1305_vm5, %v1287_v52  ;;  %v994_v48 = vadd.f32 %v962_v40, %v926_v51 }
  0xd0   : > { %v1093_v41 = vadd.f32 %v1063_v21, %v1029_v2  ;;  %v1094_v60 = vadd.f32 %v1064_v59, %v1030_v23  ;;  %v1231_v28 = vadd.f32 %v993_v58, %v821_v8 }
  0xd1   : > { %v1232_v12 = vadd.f32 %v994_v48, %v822_v7 }
  0xd2   : > { %v1157_v10 = vadd.f32 %v1127_v30, %v1093_v41  ;;  %v1158_v39 = vadd.f32 %v1128_v25, %v1094_v60 }
  0xd4   : > { %v1263_v4 = vadd.f32 %v1231_v28, %v1157_v10  ;;  %v1264_v50 = vadd.f32 %v1232_v12, %v1158_v39 }
  0xd6   : > { %v1288_v31 = vpack.c.bf16 %v1264_v50, %v1263_v4 }
  0xd8   : > { %1762 = vmatmul.mubr.msk.bf16.gmra.mrb[12].mxu0 %vm1305_vm5, %v1288_v31 }
 0x10d   : > { %v1767_v62 = vpop.f32.mrb[0].mxu1 }
 0x10e   : > { %v1465_v35 = vadd.f32 %v1767_v62, %v2981_v61  ;;  %v1456_v18 = vpop.f32.mrb[1].mxu1 }
 0x10f   : > { %v1457_v44 = vadd.f32 %v2981_v61, %v1456_v18  ;;  %v1768_v29 = vpop.f32.mrb[2].mxu1 }
 0x110   : > { %1538 = vst.msk [vmem:[%s2987_s28 + $0x90] sm:$0xff] %vm1519_vm6, %v1465_v35  ;;  %v1468_v45 = vadd.f32 %v1768_v29, %v2981_v61  ;;  %v1459_v47 = vpop.f32.mrb[3].mxu1 }
 0x111   : > { %1536 = vst.msk [vmem:[%s2987_s28 + $0x80] sm:$0xff] %vm1519_vm6, %v1457_v44  ;;  %v1460_v53 = vadd.f32 %v2981_v61, %v1459_v47 }
 0x112   : > { %1539 = vst.msk [vmem:[%s2987_s28 + $0x98] sm:$0xff] %vm1519_vm6, %v1468_v45 }
 0x113   : > { %1537 = vst.msk [vmem:[%s2987_s28 + $0x88] sm:$0xff] %vm1519_vm6, %v1460_v53 }
 0x12a   : > { %v1751_v19 = vpop.f32.mrb[0].mxu0 }
 0x12b   : > { %v1401_v46 = vadd.f32 %v1751_v19, %v2981_v61  ;;  %v1392_v26 = vpop.f32.mrb[1].mxu0 }
 0x12c   : > { %v1393_v36 = vadd.f32 %v2981_v61, %v1392_v26  ;;  %v1752_v38 = vpop.f32.mrb[2].mxu0 }
 0x12d   : > { %1522 = vst.msk [vmem:[%s2987_s28 + $0x10] sm:$0xff] %vm1519_vm6, %v1401_v46  ;;  %v1404_v6 = vadd.f32 %v1752_v38, %v2981_v61  ;;  %v1395_v15 = vpop.f32.mrb[3].mxu0 }
 0x12e   : > { %1520 = vst.msk [vmem:[%s2987_s28] sm:$0xff] %vm1519_vm6, %v1393_v36  ;;  %v1396_v11 = vadd.f32 %v2981_v61, %v1395_v15 }
 0x12f   : > { %1523 = vst.msk [vmem:[%s2987_s28 + $0x18] sm:$0xff] %vm1519_vm6, %v1404_v6 }
 0x130   : > { %1521 = vst.msk [vmem:[%s2987_s28 + $0x8] sm:$0xff] %vm1519_vm6, %v1396_v11 }
 0x140   : > { %v1771_v34 = vpop.f32.mrb[4].mxu1 }
 0x141   : > { %v1481_v43 = vadd.f32 %v1771_v34, %v2981_v61  ;;  %v1472_v0 = vpop.f32.mrb[5].mxu1 }
 0x142   : > { %v1473_v33 = vadd.f32 %v2981_v61, %v1472_v0  ;;  %v1772_v1 = vpop.f32.mrb[6].mxu1 }
 0x143   : > { %1542 = vst.msk [vmem:[%s2987_s28 + $0xb0] sm:$0xff] %vm1519_vm6, %v1481_v43  ;;  %v1484_v49 = vadd.f32 %v1772_v1, %v2981_v61  ;;  %v1475_v54 = vpop.f32.mrb[7].mxu1 }
 0x144   : > { %1540 = vst.msk [vmem:[%s2987_s28 + $0xa0] sm:$0xff] %vm1519_vm6, %v1473_v33  ;;  %v1476_v17 = vadd.f32 %v2981_v61, %v1475_v54 }
 0x145   : > { %1543 = vst.msk [vmem:[%s2987_s28 + $0xb8] sm:$0xff] %vm1519_vm6, %v1484_v49 }
 0x146   : > { %1541 = vst.msk [vmem:[%s2987_s28 + $0xa8] sm:$0xff] %vm1519_vm6, %v1476_v17 }
 0x156   : > { %v1755_v5 = vpop.f32.mrb[4].mxu0 }
 0x157   : > { %v1417_v20 = vadd.f32 %v1755_v5, %v2981_v61  ;;  %v1408_v16 = vpop.f32.mrb[5].mxu0 }
 0x158   : > { %v1409_v42 = vadd.f32 %v2981_v61, %v1408_v16  ;;  %v1756_v37 = vpop.f32.mrb[6].mxu0 }
 0x159   : > { %1526 = vst.msk [vmem:[%s2987_s28 + $0x30] sm:$0xff] %vm1519_vm6, %v1417_v20  ;;  %v1420_v55 = vadd.f32 %v1756_v37, %v2981_v61  ;;  %v1411_v13 = vpop.f32.mrb[7].mxu0 }
 0x15a   : > { %1524 = vst.msk [vmem:[%s2987_s28 + $0x20] sm:$0xff] %vm1519_vm6, %v1409_v42  ;;  %v1412_v3 = vadd.f32 %v2981_v61, %v1411_v13 }
 0x15b   : > { %1527 = vst.msk [vmem:[%s2987_s28 + $0x38] sm:$0xff] %vm1519_vm6, %v1420_v55 }
 0x15c   : > { %1525 = vst.msk [vmem:[%s2987_s28 + $0x28] sm:$0xff] %vm1519_vm6, %v1412_v3 }
 0x16d   : > { %v1775_v40 = vpop.f32.mrb[8].mxu1 }
 0x16e   : > { %v1497_v8 = vadd.f32 %v1775_v40, %v2981_v61  ;;  %v1488_v7 = vpop.f32.mrb[9].mxu1 }
 0x16f   : > { %v1489_v14 = vadd.f32 %v2981_v61, %v1488_v7  ;;  %v1776_v56 = vpop.f32.mrb[10].mxu1 }
 0x170   : > { %1546 = vst.msk [vmem:[%s2987_s28 + $0xd0] sm:$0xff] %vm1519_vm6, %v1497_v8  ;;  %v1500_v2 = vadd.f32 %v1776_v56, %v2981_v61  ;;  %v1491_v52 = vpop.f32.mrb[11].mxu1 }
 0x171   : > { %1544 = vst.msk [vmem:[%s2987_s28 + $0xc0] sm:$0xff] %vm1519_vm6, %v1489_v14  ;;  %v1492_v9 = vadd.f32 %v2981_v61, %v1491_v52 }
 0x172   : > { %1547 = vst.msk [vmem:[%s2987_s28 + $0xd8] sm:$0xff] %vm1519_vm6, %v1500_v2 }
 0x173   : > { %1545 = vst.msk [vmem:[%s2987_s28 + $0xc8] sm:$0xff] %vm1519_vm6, %v1492_v9 }
 0x183   : > { %v1759_v51 = vpop.f32.mrb[8].mxu0 }
 0x184   : > { %v1433_v57 = vadd.f32 %v1759_v51, %v2981_v61  ;;  %v1424_v23 = vpop.f32.mrb[9].mxu0 }
 0x185   : > { %v1425_v22 = vadd.f32 %v2981_v61, %v1424_v23  ;;  %v1760_v21 = vpop.f32.mrb[10].mxu0 }
 0x186   : > { %1530 = vst.msk [vmem:[%s2987_s28 + $0x50] sm:$0xff] %vm1519_vm6, %v1433_v57  ;;  %v1436_v27 = vadd.f32 %v1760_v21, %v2981_v61  ;;  %v1427_v58 = vpop.f32.mrb[11].mxu0 }
 0x187   : > { %1528 = vst.msk [vmem:[%s2987_s28 + $0x40] sm:$0xff] %vm1519_vm6, %v1425_v22  ;;  %v1428_v63 = vadd.f32 %v2981_v61, %v1427_v58 }
 0x188   : > { %1531 = vst.msk [vmem:[%s2987_s28 + $0x58] sm:$0xff] %vm1519_vm6, %v1436_v27 }
 0x189   : > { %1529 = vst.msk [vmem:[%s2987_s28 + $0x48] sm:$0xff] %vm1519_vm6, %v1428_v63 }
 0x19c   : > { %v1779_v59 = vpop.f32.mrb[12].mxu1 }
 0x19d   : > { %v1513_v32 = vadd.f32 %v1779_v59, %v2981_v61  ;;  %v1504_v30 = vpop.f32.mrb[13].mxu1 }
 0x19e   : > { %v1505_v24 = vadd.f32 %v2981_v61, %v1504_v30  ;;  %v1780_v25 = vpop.f32.mrb[14].mxu1 }
 0x19f   : > { %1550 = vst.msk [vmem:[%s2987_s28 + $0xf0] sm:$0xff] %vm1519_vm6, %v1513_v32  ;;  %v1516_v48 = vadd.f32 %v1780_v25, %v2981_v61  ;;  %v1507_v41 = vpop.f32.mrb[15].mxu1 }
 0x1a0   : > { %1548 = vst.msk [vmem:[%s2987_s28 + $0xe0] sm:$0xff] %vm1519_vm6, %v1505_v24  ;;  %v1508_v60 = vadd.f32 %v2981_v61, %v1507_v41 }
 0x1a1   : > { %1551 = vst.msk [vmem:[%s2987_s28 + $0xf8] sm:$0xff] %vm1519_vm6, %v1516_v48 }
 0x1a2   : > { %1549 = vst.msk [vmem:[%s2987_s28 + $0xe8] sm:$0xff] %vm1519_vm6, %v1508_v60 }
 0x1ab   : > { %v1763_v28 = vpop.f32.mrb[12].mxu0 }
 0x1ac   : > { %v1449_v10 = vadd.f32 %v1763_v28, %v2981_v61  ;;  %v1440_v12 = vpop.f32.mrb[13].mxu0 }
 0x1ad   : > { %v1441_v39 = vadd.f32 %v2981_v61, %v1440_v12  ;;  %v1764_v4 = vpop.f32.mrb[14].mxu0 }
 0x1ae   : > { %1534 = vst.msk [vmem:[%s2987_s28 + $0x70] sm:$0xff] %vm1519_vm6, %v1449_v10  ;;  %v1452_v50 = vadd.f32 %v1764_v4, %v2981_v61  ;;  %v1443_v31 = vpop.f32.mrb[15].mxu0 }
 0x1af   : > { %1532 = vst.msk [vmem:[%s2987_s28 + $0x60] sm:$0xff] %vm1519_vm6, %v1441_v39  ;;  %v1444_v62 = vadd.f32 %v2981_v61, %v1443_v31 }
 0x1b0   : > { %1535 = vst.msk [vmem:[%s2987_s28 + $0x78] sm:$0xff] %vm1519_vm6, %v1452_v50 }
 0x1b1   : > { %1533 = vst.msk [vmem:[%s2987_s28 + $0x68] sm:$0xff] %vm1519_vm6, %v1444_v62 }
 0x1b2 PF: > { %s16_s23 = sadd.s32 1, %s1836_s23   ;;  %s3131_s21 = smov %s1832_s22 }
 0x1b3   : > { %p13_p5 = scmp.ge.s32.totalorder %s16_s23, 4   ;;  %s3132_s22 = smov %s3134_s24 }
 0x1b5   :  { %15 = sbr.rel (!%p13_p5) target bundleno = 2 (0x2), region = 80 }

</bundles_post_ra>
